<compile_context>
chip_gen: v7x
topology: tpu7x:2x2x1
jax: 0.10.0
libtpu: 0.0.40
codegen_flags: <defaults>
</compile_context>

<pallas_src>
import functools

import jax
import jax.numpy as jnp
from jax.experimental import pallas as pl
from jax.experimental.pallas import tpu as pltpu

MATMUL_DTYPE = jnp.bfloat16          # MXU input dtype (f32 accumulation everywhere)
_INV_SQRT2 = 0.7071067811865476
_LN_EPS = 1e-5                       # nn.LayerNorm default
_VMEM_LIMIT = 48 * 1024 * 1024       # explicit scoped-VMEM budget (fits v7x 64 MiB physical)


# ---------------------------------------------------------------------------
# small helpers
# ---------------------------------------------------------------------------

def _round_up(x, m):
    return ((x + m - 1) // m) * m


def _tile_dim(dim, target):
    """Return (tile, padded_dim). Small dims use the full dim (no padding)."""
    if dim <= target:
        return dim, dim
    return target, _round_up(dim, target)


def _pad2(a, rows, cols):
    r, c = a.shape
    if r == rows and c == cols:
        return a
    return jnp.pad(a, ((0, rows - r), (0, cols - c)))


def _gelu_f32(x):
    # exact GELU (nn.GELU default)
    return 0.5 * x * (1.0 + jax.lax.erf(x * _INV_SQRT2))


# ---------------------------------------------------------------------------
# LayerNorm (standalone; optionally fused with a residual add after normalization)
# ---------------------------------------------------------------------------

def _ln_kernel(*refs, has_res, eps):
    it = iter(refs)
    x_ref = next(it)
    g_ref = next(it)
    b_ref = next(it)
    r_ref = next(it) if has_res else None
    o_ref = next(it)

    x = x_ref[...].astype(jnp.float32)
    mu = jnp.mean(x, axis=-1, keepdims=True)
    var = jnp.mean(jnp.square(x - mu), axis=-1, keepdims=True)
    y = (x - mu) * jax.lax.rsqrt(var + eps) * g_ref[...] + b_ref[...]
    if has_res:
        y = y + r_ref[...].astype(jnp.float32)
    o_ref[...] = y.astype(o_ref.dtype)


def layernorm(x2d, g, b, residual=None, eps=_LN_EPS, tm_target=512):
    M, D = x2d.shape
    tm, Mp = _tile_dim(M, tm_target)

    args = [_pad2(x2d, Mp, D),
            g.reshape(1, D).astype(jnp.float32),
            b.reshape(1, D).astype(jnp.float32)]
    in_specs = [pl.BlockSpec((tm, D), lambda i: (i, 0)),
                pl.BlockSpec((1, D), lambda i: (0, 0)),
                pl.BlockSpec((1, D), lambda i: (0, 0))]
    has_res = residual is not None
    if has_res:
        args.append(_pad2(residual, Mp, D))
        in_specs.append(pl.BlockSpec((tm, D), lambda i: (i, 0)))

    out = pl.pallas_call(
        functools.partial(_ln_kernel, has_res=has_res, eps=eps),
        out_shape=jax.ShapeDtypeStruct((Mp, D), jnp.float32),
        grid=(Mp // tm,),
        in_specs=in_specs,
        out_specs=pl.BlockSpec((tm, D), lambda i: (i, 0)),
        compiler_params=pltpu.CompilerParams(
            dimension_semantics=("parallel",),
            vmem_limit_bytes=_VMEM_LIMIT),
    )(*args)
    return out[:M] if Mp != M else out


# ---------------------------------------------------------------------------
# Tiled dense matmul:  y = [LN](x) @ W (+ b) (+ residual)
#   - weights are expected pre-cast to bf16 (done once in prepare_params)
#   - activations are cast to bf16 in-kernel (no wrapper-side copies)
#   - when nk > 1 the f32 output block is used as the accumulator directly
# ---------------------------------------------------------------------------

def _dense_kernel(*refs, has_ln, has_bias, has_res, nk, use_acc, eps):
    it = iter(refs)
    x_ref = next(it)
    w_ref = next(it)
    g_ref = next(it) if has_ln else None
    bln_ref = next(it) if has_ln else None
    b_ref = next(it) if has_bias else None
    r_ref = next(it) if has_res else None
    o_ref = next(it)
    acc_ref = next(it) if use_acc else None

    x = x_ref[...]
    if has_ln:
        xf = x.astype(jnp.float32)
        mu = jnp.mean(xf, axis=-1, keepdims=True)
        var = jnp.mean(jnp.square(xf - mu), axis=-1, keepdims=True)
        x = (xf - mu) * jax.lax.rsqrt(var + eps) * g_ref[...] + bln_ref[...]

    part = jnp.dot(x.astype(MATMUL_DTYPE), w_ref[...],
                   preferred_element_type=jnp.float32)

    def epilogue(y):
        if has_bias:
            y = y + b_ref[...]
        if has_res:
            y = y + r_ref[...].astype(jnp.float32)
        return y

    if nk == 1:
        o_ref[...] = epilogue(part).astype(o_ref.dtype)
    else:
        k = pl.program_id(2)
        acc = acc_ref if use_acc else o_ref

        @pl.when(k == 0)
        def _():
            acc[...] = jnp.zeros_like(acc)

        acc[...] += part

        if has_bias or has_res or use_acc:
            @pl.when(k == nk - 1)
            def _():
                o_ref[...] = epilogue(acc[...]).astype(o_ref.dtype)


def dense(x, w, b=None, residual=None, ln=None, out_dtype=jnp.float32,
          tm_target=256, tn_target=256, tk_target=512):
    """Tiled, pipelined matmul.  w is [K, N] (ideally already bf16)."""
    M, K = x.shape
    K2, N = w.shape
    assert K == K2

    tm, Mp = _tile_dim(M, tm_target)
    tn, Np = _tile_dim(N, tn_target)
    tk, Kp = _tile_dim(K, tk_target)
    nk = Kp // tk

    # Fused LN prologue requires the full feature dim in one K tile.
    if ln is not None and nk != 1:
        x = layernorm(x, ln[0], ln[1])
        ln = None
    has_ln = ln is not None
    has_bias = b is not None
    has_res = residual is not None
    use_acc = (nk > 1) and (out_dtype != jnp.float32)

    args = [_pad2(x, Mp, Kp), _pad2(w, Kp, Np)]
    in_specs = [pl.BlockSpec((tm, tk), lambda i, j, k: (i, k)),
                pl.BlockSpec((tk, tn), lambda i, j, k: (k, j))]
    if has_ln:
        args += [ln[0].reshape(1, K).astype(jnp.float32),
                 ln[1].reshape(1, K).astype(jnp.float32)]
        in_specs += [pl.BlockSpec((1, tk), lambda i, j, k: (0, k)),
                     pl.BlockSpec((1, tk), lambda i, j, k: (0, k))]
    if has_bias:
        args.append(_pad2(b.reshape(1, N).astype(jnp.float32), 1, Np))
        in_specs.append(pl.BlockSpec((1, tn), lambda i, j, k: (0, j)))
    if has_res:
        args.append(_pad2(residual, Mp, Np))
        in_specs.append(pl.BlockSpec((tm, tn), lambda i, j, k: (i, j)))

    kern = functools.partial(_dense_kernel, has_ln=has_ln, has_bias=has_bias,
                             has_res=has_res, nk=nk, use_acc=use_acc, eps=_LN_EPS)
    out = pl.pallas_call(
        kern,
        out_shape=jax.ShapeDtypeStruct((Mp, Np), out_dtype),
        grid=(Mp // tm, Np // tn, nk),
        in_specs=in_specs,
        out_specs=pl.BlockSpec((tm, tn), lambda i, j, k: (i, j)),
        scratch_shapes=[pltpu.VMEM((tm, tn), jnp.float32)] if use_acc else [],
        compiler_params=pltpu.CompilerParams(
            dimension_semantics=("parallel", "parallel", "arbitrary"),
            vmem_limit_bytes=_VMEM_LIMIT),
    )(*args)
    if Mp != M or Np != N:
        out = out[:M, :N]
    return out


# ---------------------------------------------------------------------------
# MLA attention: fused RoPE + causal softmax + GQA kv-head sharing, per batch
# ---------------------------------------------------------------------------

def _mla_attn_kernel(q_ref, k_ref, v_ref, cos_ref, sin_ref, o_ref, *,
                     n_head, kv_heads, head_dim, scale):
    q = q_ref[0]                      # (S, H*hd)   bf16
    k = k_ref[0]                      # (S, KVH*hd) bf16
    v = v_ref[0]
    cos = cos_ref[...]                # (S, hd//2)  f32
    sin = sin_ref[...]

    S = q.shape[0]
    hd = head_dim
    h2 = hd // 2
    rep = n_head // kv_heads

    row = jax.lax.broadcasted_iota(jnp.int32, (S, S), 0)
    col = jax.lax.broadcasted_iota(jnp.int32, (S, S), 1)
    mask = col > row
    neg = jnp.float32(-1e30)

    def rope(xh):
        # rotate-half form (projection weight columns were de-interleaved once at init, so
        # q.k dot products match the reference's interleaved-pair RoPE exactly).
        x1 = xh[:, :h2]
        x2 = xh[:, h2:]
        return jnp.concatenate([x1 * cos - x2 * sin, x1 * sin + x2 * cos], axis=-1)

    per_head_store = (hd % 128 == 0)   # lane-aligned per-head stores; else one dense concat
    outs = []
    for g in range(kv_heads):          # static, unrolled
        # k-RoPE / v-slice computed ONCE per kv head, reused by all rep query heads
        kh = rope(k[:, g * hd:(g + 1) * hd].astype(jnp.float32)).astype(MATMUL_DTYPE)
        vh = v[:, g * hd:(g + 1) * hd]
        for r in range(rep):
            h = g * rep + r            # repeat_interleave semantics: head h -> kv head h//rep
            qh = rope(q[:, h * hd:(h + 1) * hd].astype(jnp.float32)).astype(MATMUL_DTYPE)

            s = jax.lax.dot_general(
                qh, kh, (((1,), (1,)), ((), ())),
                preferred_element_type=jnp.float32) * scale
            s = jnp.where(mask, neg, s)                       # causal
            m = jnp.max(s, axis=-1, keepdims=True)
            p = jnp.exp(s - m)
            p = p * pl.reciprocal(jnp.sum(p, axis=-1, keepdims=True), approx=False)
            oh = jnp.dot(p.astype(MATMUL_DTYPE), vh, preferred_element_type=jnp.float32)
            if per_head_store:
                o_ref[0, :, h * hd:(h + 1) * hd] = oh.astype(o_ref.dtype)
            else:
                outs.append(oh)
    if not per_head_store:
        o_ref[0] = jnp.concatenate(outs, axis=-1).astype(o_ref.dtype)


def attention(q, k, v, cos, sin, n_head, kv_heads, head_dim):
    B, S, D = q.shape
    Dkv = k.shape[-1]
    h2 = head_dim // 2
    kern = functools.partial(_mla_attn_kernel, n_head=n_head, kv_heads=kv_heads,
                             head_dim=head_dim, scale=head_dim ** (-0.5))
    return pl.pallas_call(
        kern,
        out_shape=jax.ShapeDtypeStruct((B, S, D), MATMUL_DTYPE),
        grid=(B,),
        in_specs=[
            pl.BlockSpec((1, S, D), lambda b: (b, 0, 0)),
            pl.BlockSpec((1, S, Dkv), lambda b: (b, 0, 0)),
            pl.BlockSpec((1, S, Dkv), lambda b: (b, 0, 0)),
            pl.BlockSpec((S, h2), lambda b: (0, 0)),
            pl.BlockSpec((S, h2), lambda b: (0, 0)),
        ],
        out_specs=pl.BlockSpec((1, S, D), lambda b: (b, 0, 0)),
        compiler_params=pltpu.CompilerParams(
            dimension_semantics=("parallel",),
            vmem_limit_bytes=_VMEM_LIMIT),
    )(q, k, v, cos, sin)


# ---------------------------------------------------------------------------
# Mixture of Experts: expert axis AND hidden-dim chunk axis tiled on the grid,
# output accumulated in place (resident f32 block). Expert weights stream as
# (D, hchunk)/(hchunk, D) bf16 tiles -> bounded VMEM on v7x.
# ---------------------------------------------------------------------------

def _moe_kernel(x_ref, gate_ref, wfc_ref, bfc_ref, wproj_ref, bproj_ref, o_ref):
    e = pl.program_id(1)
    hc = pl.program_id(2)

    @pl.when(jnp.logical_and(e == 0, hc == 0))
    def _():
        o_ref[...] = jnp.zeros_like(o_ref)

    x = x_ref[...].astype(MATMUL_DTYPE)                            # (tm, D)
    h = jnp.dot(x, wfc_ref[0], preferred_element_type=jnp.float32) + bfc_ref[0]
    h = _gelu_f32(h)                                               # (tm, hchunk) f32
    y = jnp.dot(h.astype(MATMUL_DTYPE), wproj_ref[0],
                preferred_element_type=jnp.float32)                # (tm, D)

    gate = gate_ref[...]                                           # (tm, E) f32
    lane = jax.lax.broadcasted_iota(jnp.int32, gate.shape, 1)
    g_e = jnp.sum(jnp.where(lane == e, gate, 0.0), axis=-1, keepdims=True)  # (tm, 1)

    @pl.when(hc == 0)
    def _():
        o_ref[...] += g_e * bproj_ref[0]                           # expert proj bias (once)

    o_ref[...] += g_e * y


def moe(lp, h, cfg):
    """h: (M, D) f32 layernormed input. Returns (pre-LN expert mixture, router logits)."""
    M, D = h.shape
    E = cfg["moe_num_experts"]
    K = cfg["moe_top_k"]
    hidden = lp["wfc"].shape[2]

    router_logits = dense(h, lp["router_w"])                       # (M, E), bias=False
    topv, topi = jax.lax.top_k(router_logits, K)
    topp = jax.nn.softmax(topv, axis=-1)
    # dense gate: weight of expert e = its top-k softmax prob if selected, else 0
    gate = jnp.sum(jax.nn.one_hot(topi, E, dtype=jnp.float32) * topp[..., None], axis=1)

    # TODO(synk): grouped top-k GEMM (scalar-prefetch token-group offsets) would skip
    #             unselected experts (E/K fewer FLOPs and weight bytes).

    tm, Mp = _tile_dim(M, 512)        # large row tile -> expert weights re-streamed less often
    hchunk = hidden if (hidden <= 512 or hidden % 512 != 0) else 512
    nhc = hidden // hchunk

    hp = _pad2(h, Mp, D)
    gp = _pad2(gate, Mp, E)

    mix = pl.pallas_call(
        _moe_kernel,
        out_shape=jax.ShapeDtypeStruct((Mp, D), jnp.float32),
        grid=(Mp // tm, E, nhc),
        in_specs=[
            pl.BlockSpec((tm, D), lambda i, e, hc: (i, 0)),
            pl.BlockSpec((tm, E), lambda i, e, hc: (i, 0)),
            pl.BlockSpec((1, D, hchunk), lambda i, e, hc: (e, 0, hc)),
            pl.BlockSpec((1, 1, hchunk), lambda i, e, hc: (e, 0, hc)),
            pl.BlockSpec((1, hchunk, D), lambda i, e, hc: (e, hc, 0)),
            pl.BlockSpec((1, 1, D), lambda i, e, hc: (e, 0, 0)),
        ],
        out_specs=pl.BlockSpec((tm, D), lambda i, e, hc: (i, 0)),
        compiler_params=pltpu.CompilerParams(
            dimension_semantics=("parallel", "arbitrary", "arbitrary"),
            vmem_limit_bytes=_VMEM_LIMIT),
    )(hp, gp, lp["wfc"], lp["bfc"], lp["wproj"], lp["bproj"])

    if Mp != M:
        mix = mix[:M]
    return mix, router_logits


# ---------------------------------------------------------------------------
# Model glue
# ---------------------------------------------------------------------------

def rope_tables(seq_len, dim):
    inv_freq = 1.0 / (10000.0 ** (jnp.arange(0, dim, 2, dtype=jnp.float32) / dim))
    t = jnp.arange(seq_len, dtype=jnp.float32)
    freqs = jnp.outer(t, inv_freq)          # (S, dim/2)
    return jnp.cos(freqs), jnp.sin(freqs)


def _deinterleave_heads(w, n_heads, hd):
    """Permute weight columns per head: [even positions | odd positions] (rotate-half RoPE)."""
    K = w.shape[0]
    w3 = w.reshape(K, n_heads, hd)
    w3 = jnp.concatenate([w3[..., 0::2], w3[..., 1::2]], axis=-1)
    return w3.reshape(K, n_heads * hd)


def prepare_params(params, cfg):
    """One-time conversion of the torch-like f32 parameter tree into the inference tree:
    bf16 weight casts, q/k RoPE column permutation, wqa||wkva and wk||wv fusions, and the
    transposed tied lm_head weight."""
    D = cfg["n_embd"]
    H = cfg["n_head"]
    hd = D // H
    kvh = cfg["mla_kv_heads"]
    Dkv = kvh * hd

    out = {
        "wte": params["wte"],                                   # f32 embedding gather
        "wpe": params["wpe"],
        "lnf_g": params["lnf_g"], "lnf_b": params["lnf_b"],
        "lm_head_w": params["wte"].T.astype(MATMUL_DTYPE),      # [D, V] bf16 (tied weight)
        "layers": [],
    }
    for lp in params["layers"]:
        kvd = lp["wkvb"].shape[0]
        wq_b = _deinterleave_heads(lp["wqb"], H, hd)
        kvb = lp["wkvb"].reshape(kvd, kvh, hd, 2)
        wk = _deinterleave_heads(kvb[..., 0].reshape(kvd, Dkv), kvh, hd)
        wv = kvb[..., 1].reshape(kvd, Dkv)

        out["layers"].append({
            "ln1_g": lp["ln1_g"], "ln1_b": lp["ln1_b"],
            "ln2_g": lp["ln2_g"], "ln2_b": lp["ln2_b"],
            "moe_ln_g": lp["moe_ln_g"], "moe_ln_b": lp["moe_ln_b"],
            # MLA projections (pre-fused, bf16)
            "wqkv_a": jnp.concatenate([lp["wqa"], lp["wkva"]], axis=1).astype(MATMUL_DTYPE),
            "wq_b": wq_b.astype(MATMUL_DTYPE),
            "wkv_b": jnp.concatenate([wk, wv], axis=1).astype(MATMUL_DTYPE),
            "wout": lp["wout"].astype(MATMUL_DTYPE),
            "bout": lp["bout"],
            # MoE (bf16 weights, f32 biases)
            "router_w": lp["router_w"].astype(MATMUL_DTYPE),
            "wfc": lp["wfc"].astype(MATMUL_DTYPE),
            "bfc": lp["bfc"],
            "wproj": lp["wproj"].astype(MATMUL_DTYPE),
            "bproj": lp["bproj"],
        })
    return out


def mla_attention(lp, x_flat, B, S, cos, sin, cfg):
    """x_flat: (B*S, D) f32 residual stream. LN1 is fused into the q/kv-A projection.
    Returns (B*S, D) f32 = x_flat + out_proj(attention)."""
    D = cfg["n_embd"]
    H = cfg["n_head"]
    hd = D // H
    kvh = cfg["mla_kv_heads"]
    Dkv = kvh * hd
    qd = cfg["mla_q_proj_dim"]

    # fused LN1 + combined q_a/kv_a projection (single pass over x), bf16 intermediates
    qkv_lat = dense(x_flat, lp["wqkv_a"], ln=(lp["ln1_g"], lp["ln1_b"]),
                    out_dtype=MATMUL_DTYPE)                       # (M, qd+kvd) bf16
    q_lat = qkv_lat[:, :qd]
    kv_lat = qkv_lat[:, qd:]

    q = dense(q_lat, lp["wq_b"], out_dtype=MATMUL_DTYPE)          # (M, D)     bf16
    kv = dense(kv_lat, lp["wkv_b"], out_dtype=MATMUL_DTYPE)       # (M, 2*Dkv) bf16
    k = kv[:, :Dkv]
    v = kv[:, Dkv:]

    o = attention(q.reshape(B, S, D), k.reshape(B, S, Dkv), v.reshape(B, S, Dkv),
                  cos, sin, H, kvh, hd)                           # (B,S,D) bf16, RoPE+causal
    # out projection with fused bias + residual add (back to f32 residual stream)
    return dense(o.reshape(B * S, D), lp["wout"], lp["bout"], residual=x_flat)


def deepseek_forward(params, input_ids, cfg):
    B, S = input_ids.shape
    D = cfg["n_embd"]
    H = cfg["n_head"]
    hd = D // H
    assert S <= cfg["block_size"]

    tok = params["wte"][input_ids]                                # embedding gather (glue)
    pos = params["wpe"][:S]
    x = tok + pos[None, :, :]                                     # dropout = identity (eval)

    cos, sin = rope_tables(S, hd)                                 # hoisted out of layer loop

    x_flat = x.reshape(B * S, D)
    for lp in params["layers"]:
        # attention block: LN1 fused into qkv projection, residual fused into out_proj
        x_flat = mla_attention(lp, x_flat, B, S, cos, sin, cfg)

        # MoE block
        h = layernorm(x_flat, lp["ln2_g"], lp["ln2_b"])           # ln2(x)
        mix, _router_logits = moe(lp, h, cfg)                     # pre-LN expert mixture
        # post-MoE LayerNorm fused with the residual add:  x = x + moe.ln(mixture)
        x_flat = layernorm(mix, lp["moe_ln_g"], lp["moe_ln_b"], residual=x_flat)

    xf = layernorm(x_flat, params["lnf_g"], params["lnf_b"]).reshape(B, S, D)
    last = xf[:, -1, :]                                           # x[:, [-1], :]
    # tied lm_head against the pre-transposed [D, V] bf16 weight (no in-kernel transpose)
    logits = dense(last, params["lm_head_w"])
    return logits.reshape(B, 1, cfg["vocab_size"]), None


# ---------------------------------------------------------------------------
# Deterministic parameter init (matching shapes / init scheme of the nn.Module)
# ---------------------------------------------------------------------------

def init_params(cfg, key):
    std = 0.02
    keys = iter(jax.random.split(key, 8 + 16 * cfg["n_layer"]))
    nk = lambda: next(keys)
    normal = lambda shape: std * jax.random.normal(nk(), shape, jnp.float32)

    D = cfg["n_embd"]
    V = cfg["vocab_size"]
    H = cfg["n_head"]
    hd = D // H
    kvh = cfg["mla_kv_heads"]
    E = cfg["moe_num_experts"]

    params = {
        "wte": normal((V, D)),                    # tied with lm_head
        "wpe": normal((cfg["block_size"], D)),
        "lnf_g": jnp.ones((D,), jnp.float32),
        "lnf_b": jnp.zeros((D,), jnp.float32),
        "layers": [],
    }
    for _ in range(cfg["n_layer"]):
        layer = {
            "ln1_g": jnp.ones((D,), jnp.float32), "ln1_b": jnp.zeros((D,), jnp.float32),
            "ln2_g": jnp.ones((D,), jnp.float32), "ln2_b": jnp.zeros((D,), jnp.float32),
            # MLA projections (stored [in, out])
            "wqa": normal((D, cfg["mla_q_proj_dim"])),
            "wqb": normal((cfg["mla_q_proj_dim"], D)),
            "wkva": normal((D, cfg["mla_kv_proj_dim"])),
            "wkvb": normal((cfg["mla_kv_proj_dim"], kvh * hd * 2)),
            "wout": normal((D, D)),
            "bout": jnp.zeros((D,), jnp.float32),
            # MoE
            "router_w": normal((D, E)),
            "wfc": normal((E, D, 4 * D)),
            "bfc": jnp.zeros((E, 1, 4 * D), jnp.float32),
            "wproj": normal((E, 4 * D, D)),
            "bproj": jnp.zeros((E, 1, D), jnp.float32),
            "moe_ln_g": jnp.ones((D,), jnp.float32),
            "moe_ln_b": jnp.zeros((D,), jnp.float32),
        }
        params["layers"].append(layer)
    return params


# ---------------------------------------------------------------------------

if __name__ == "__main__":
    cfg = dict(
        vocab_size=128,
        n_layer=2,
        n_head=4,
        n_embd=32,
        block_size=16,
        mla_kv_heads=2,
        mla_q_proj_dim=16,
        mla_kv_proj_dim=8,
        moe_num_experts=4,
        moe_top_k=2,
    )
    key = jax.random.PRNGKey(0)
    pkey, ikey = jax.random.split(key)
    raw_params = init_params(cfg, pkey)
    params = prepare_params(raw_params, cfg)      # one-time bf16 cast / permute / fuse

    B, S = 2, 8
    input_ids = jax.random.randint(ikey, (B, S), 0, cfg["vocab_size"], dtype=jnp.int32)

    fwd = jax.jit(functools.partial(deepseek_forward, cfg=cfg))
    logits, loss = fwd(params, input_ids)
    jax.block_until_ready(logits)
    assert logits.shape == (B, 1, cfg["vocab_size"])
    assert loss is None
    print("KERNEL_OK")
</pallas_src>

<mosaic_0001>
module attributes {stable_mosaic.version = 11 : i64} {
  func.func @_dense_kernel(%arg0: i32, %arg1: i32, %arg2: i32, %arg3: memref<16x32xf32, #tpu.memory_space<vmem>>, %arg4: memref<32x24xbf16, #tpu.memory_space<vmem>>, %arg5: memref<1x32xf32, #tpu.memory_space<vmem>>, %arg6: memref<1x32xf32, #tpu.memory_space<vmem>>, %arg7: memref<16x24xbf16, #tpu.memory_space<vmem>>) attributes {dimension_semantics = [#tpu.dimension_semantics<parallel>, #tpu.dimension_semantics<parallel>, #tpu.dimension_semantics<arbitrary>], iteration_bounds = array<i64: 1, 1, 1>, scalar_prefetch = 0 : i64, scratch_operands = 0 : i64, tpu.core_type = #tpu.core_type<tc>, window_params = [{transform_indices = @transform_0, window_bounds = array<i64: 16, 32>}, {transform_indices = @transform_1, window_bounds = array<i64: 32, 24>}, {transform_indices = @transform_2, window_bounds = array<i64: 1, 32>}, {transform_indices = @transform_3, window_bounds = array<i64: 1, 32>}, {transform_indices = @transform_4, window_bounds = array<i64: 16, 24>}]} {
    %c0 = arith.constant 0 : index
    %c0_0 = arith.constant 0 : index
    %0 = vector.load %arg3[%c0, %c0_0] : memref<16x32xf32, #tpu.memory_space<vmem>>, vector<16x32xf32>
    %cst = arith.constant dense<0.000000e+00> : vector<16xf32>
    %1 = vector.multi_reduction <add>, %0, %cst [1] : vector<16x32xf32> to vector<16xf32>
    %2 = vector.shape_cast %1 : vector<16xf32> to vector<16x1xf32>
    %cst_1 = arith.constant 3.200000e+01 : f32
    %3 = vector.broadcast %cst_1 : f32 to vector<16x1xf32>
    %4 = arith.divf %2, %3 : vector<16x1xf32>
    %5 = vector.broadcast %4 : vector<16x1xf32> to vector<16x32xf32>
    %6 = arith.subf %0, %5 : vector<16x32xf32>
    %7 = arith.mulf %6, %6 : vector<16x32xf32>
    %cst_2 = arith.constant dense<0.000000e+00> : vector<16xf32>
    %8 = vector.multi_reduction <add>, %7, %cst_2 [1] : vector<16x32xf32> to vector<16xf32>
    %9 = vector.shape_cast %8 : vector<16xf32> to vector<16x1xf32>
    %cst_3 = arith.constant 3.200000e+01 : f32
    %10 = vector.broadcast %cst_3 : f32 to vector<16x1xf32>
    %11 = arith.divf %9, %10 : vector<16x1xf32>
    %12 = vector.broadcast %4 : vector<16x1xf32> to vector<16x32xf32>
    %13 = arith.subf %0, %12 : vector<16x32xf32>
    %cst_4 = arith.constant 9.99999974E-6 : f32
    %14 = vector.broadcast %cst_4 : f32 to vector<16x1xf32>
    %15 = arith.addf %11, %14 : vector<16x1xf32>
    %16 = math.rsqrt %15 : vector<16x1xf32>
    %17 = vector.broadcast %16 : vector<16x1xf32> to vector<16x32xf32>
    %18 = arith.mulf %13, %17 : vector<16x32xf32>
    %c0_5 = arith.constant 0 : index
    %c0_6 = arith.constant 0 : index
    %19 = vector.load %arg5[%c0_5, %c0_6] : memref<1x32xf32, #tpu.memory_space<vmem>>, vector<1x32xf32>
    %20 = vector.broadcast %19 : vector<1x32xf32> to vector<16x32xf32>
    %21 = arith.mulf %18, %20 : vector<16x32xf32>
    %c0_7 = arith.constant 0 : index
    %c0_8 = arith.constant 0 : index
    %22 = vector.load %arg6[%c0_7, %c0_8] : memref<1x32xf32, #tpu.memory_space<vmem>>, vector<1x32xf32>
    %23 = vector.broadcast %22 : vector<1x32xf32> to vector<16x32xf32>
    %24 = arith.addf %21, %23 : vector<16x32xf32>
    %25 = arith.truncf %24 : vector<16x32xf32> to vector<16x32xbf16>
    %c0_9 = arith.constant 0 : index
    %c0_10 = arith.constant 0 : index
    %26 = vector.load %arg4[%c0_9, %c0_10] : memref<32x24xbf16, #tpu.memory_space<vmem>>, vector<32x24xbf16>
    %cst_11 = arith.constant dense<0.000000e+00> : vector<16x24xf32>
    %27 = tpu.matmul %25, %26, %cst_11 {dimension_numbers = #tpu.dot_dimension_numbers<[1], [0], [0], [1], [0, 0, 1, 1], [], []>} : vector<16x32xbf16>, vector<32x24xbf16>, vector<16x24xf32> -> vector<16x24xf32>
    %28 = arith.truncf %27 : vector<16x24xf32> to vector<16x24xbf16>
    %c0_12 = arith.constant 0 : index
    %c0_13 = arith.constant 0 : index
    %29 = vector.load %arg7[%c0_12, %c0_13] : memref<16x24xbf16, #tpu.memory_space<vmem>>, vector<16x24xbf16>
    tpu.vector_store %arg7[%c0_12, %c0_13], %28 {strides = array<i32>} : memref<16x24xbf16, #tpu.memory_space<vmem>>, vector<16x24xbf16>,
    return
  }
  func.func @transform_0(%arg0: i32, %arg1: i32, %arg2: i32) -> (i32, i32) {
    %c0_i32 = arith.constant 0 : i32
    return %arg0, %arg2 : i32, i32
  }
  func.func @transform_1(%arg0: i32, %arg1: i32, %arg2: i32) -> (i32, i32) {
    %c0_i32 = arith.constant 0 : i32
    return %arg2, %arg1 : i32, i32
  }
  func.func @transform_2(%arg0: i32, %arg1: i32, %arg2: i32) -> (i32, i32) {
    %c0_i32 = arith.constant 0 : i32
    %c0_i32_0 = arith.constant 0 : i32
    return %c0_i32, %arg2 : i32, i32
  }
  func.func @transform_3(%arg0: i32, %arg1: i32, %arg2: i32) -> (i32, i32) {
    %c0_i32 = arith.constant 0 : i32
    %c0_i32_0 = arith.constant 0 : i32
    return %c0_i32, %arg2 : i32, i32
  }
  func.func @transform_4(%arg0: i32, %arg1: i32, %arg2: i32) -> (i32, i32) {
    %c0_i32 = arith.constant 0 : i32
    return %arg0, %arg1 : i32, i32
  }
}

module attributes {stable_mosaic.version = 11 : i64} {
  func.func @_dense_kernel(%arg0: i32, %arg1: i32, %arg2: i32, %arg3: memref<16x8xbf16, #tpu.memory_space<vmem>>, %arg4: memref<8x32xbf16, #tpu.memory_space<vmem>>, %arg5: memref<16x32xbf16, #tpu.memory_space<vmem>>) attributes {dimension_semantics = [#tpu.dimension_semantics<parallel>, #tpu.dimension_semantics<parallel>, #tpu.dimension_semantics<arbitrary>], iteration_bounds = array<i64: 1, 1, 1>, scalar_prefetch = 0 : i64, scratch_operands = 0 : i64, tpu.core_type = #tpu.core_type<tc>, window_params = [{transform_indices = @transform_0, window_bounds = array<i64: 16, 8>}, {transform_indices = @transform_1, window_bounds = array<i64: 8, 32>}, {transform_indices = @transform_2, window_bounds = array<i64: 16, 32>}]} {
    %c0 = arith.constant 0 : index
    %c0_0 = arith.constant 0 : index
    %0 = vector.load %arg3[%c0, %c0_0] : memref<16x8xbf16, #tpu.memory_space<vmem>>, vector<16x8xbf16>
    %c0_1 = arith.constant 0 : index
    %c0_2 = arith.constant 0 : index
    %1 = vector.load %arg4[%c0_1, %c0_2] : memref<8x32xbf16, #tpu.memory_space<vmem>>, vector<8x32xbf16>
    %cst = arith.constant dense<0.000000e+00> : vector<16x32xf32>
    %2 = tpu.matmul %0, %1, %cst {dimension_numbers = #tpu.dot_dimension_numbers<[1], [0], [0], [1], [0, 0, 1, 1], [], []>} : vector<16x8xbf16>, vector<8x32xbf16>, vector<16x32xf32> -> vector<16x32xf32>
    %3 = arith.truncf %2 : vector<16x32xf32> to vector<16x32xbf16>
    %c0_3 = arith.constant 0 : index
    %c0_4 = arith.constant 0 : index
    %4 = vector.load %arg5[%c0_3, %c0_4] : memref<16x32xbf16, #tpu.memory_space<vmem>>, vector<16x32xbf16>
    tpu.vector_store %arg5[%c0_3, %c0_4], %3 {strides = array<i32>} : memref<16x32xbf16, #tpu.memory_space<vmem>>, vector<16x32xbf16>,
    return
  }
  func.func @transform_0(%arg0: i32, %arg1: i32, %arg2: i32) -> (i32, i32) {
    %c0_i32 = arith.constant 0 : i32
    return %arg0, %arg2 : i32, i32
  }
  func.func @transform_1(%arg0: i32, %arg1: i32, %arg2: i32) -> (i32, i32) {
    %c0_i32 = arith.constant 0 : i32
    return %arg2, %arg1 : i32, i32
  }
  func.func @transform_2(%arg0: i32, %arg1: i32, %arg2: i32) -> (i32, i32) {
    %c0_i32 = arith.constant 0 : i32
    return %arg0, %arg1 : i32, i32
  }
}

module attributes {stable_mosaic.version = 11 : i64} {
  func.func @_dense_kernel(%arg0: i32, %arg1: i32, %arg2: i32, %arg3: memref<16x16xbf16, #tpu.memory_space<vmem>>, %arg4: memref<16x32xbf16, #tpu.memory_space<vmem>>, %arg5: memref<16x32xbf16, #tpu.memory_space<vmem>>) attributes {dimension_semantics = [#tpu.dimension_semantics<parallel>, #tpu.dimension_semantics<parallel>, #tpu.dimension_semantics<arbitrary>], iteration_bounds = array<i64: 1, 1, 1>, scalar_prefetch = 0 : i64, scratch_operands = 0 : i64, tpu.core_type = #tpu.core_type<tc>, window_params = [{transform_indices = @transform_0, window_bounds = array<i64: 16, 16>}, {transform_indices = @transform_1, window_bounds = array<i64: 16, 32>}, {transform_indices = @transform_2, window_bounds = array<i64: 16, 32>}]} {
    %c0 = arith.constant 0 : index
    %c0_0 = arith.constant 0 : index
    %0 = vector.load %arg3[%c0, %c0_0] : memref<16x16xbf16, #tpu.memory_space<vmem>>, vector<16x16xbf16>
    %c0_1 = arith.constant 0 : index
    %c0_2 = arith.constant 0 : index
    %1 = vector.load %arg4[%c0_1, %c0_2] : memref<16x32xbf16, #tpu.memory_space<vmem>>, vector<16x32xbf16>
    %cst = arith.constant dense<0.000000e+00> : vector<16x32xf32>
    %2 = tpu.matmul %0, %1, %cst {dimension_numbers = #tpu.dot_dimension_numbers<[1], [0], [0], [1], [0, 0, 1, 1], [], []>} : vector<16x16xbf16>, vector<16x32xbf16>, vector<16x32xf32> -> vector<16x32xf32>
    %3 = arith.truncf %2 : vector<16x32xf32> to vector<16x32xbf16>
    %c0_3 = arith.constant 0 : index
    %c0_4 = arith.constant 0 : index
    %4 = vector.load %arg5[%c0_3, %c0_4] : memref<16x32xbf16, #tpu.memory_space<vmem>>, vector<16x32xbf16>
    tpu.vector_store %arg5[%c0_3, %c0_4], %3 {strides = array<i32>} : memref<16x32xbf16, #tpu.memory_space<vmem>>, vector<16x32xbf16>,
    return
  }
  func.func @transform_0(%arg0: i32, %arg1: i32, %arg2: i32) -> (i32, i32) {
    %c0_i32 = arith.constant 0 : i32
    return %arg0, %arg2 : i32, i32
  }
  func.func @transform_1(%arg0: i32, %arg1: i32, %arg2: i32) -> (i32, i32) {
    %c0_i32 = arith.constant 0 : i32
    return %arg2, %arg1 : i32, i32
  }
  func.func @transform_2(%arg0: i32, %arg1: i32, %arg2: i32) -> (i32, i32) {
    %c0_i32 = arith.constant 0 : i32
    return %arg0, %arg1 : i32, i32
  }
}

module attributes {stable_mosaic.version = 11 : i64} {
  func.func @_mla_attn_kernel(%arg0: i32, %arg1: memref<1x8x32xbf16, #tpu.memory_space<vmem>>, %arg2: memref<1x8x16xbf16, #tpu.memory_space<vmem>>, %arg3: memref<1x8x16xbf16, #tpu.memory_space<vmem>>, %arg4: memref<8x4xf32, #tpu.memory_space<vmem>>, %arg5: memref<8x4xf32, #tpu.memory_space<vmem>>, %arg6: memref<1x8x32xbf16, #tpu.memory_space<vmem>>) attributes {dimension_semantics = [#tpu.dimension_semantics<parallel>], iteration_bounds = array<i64: 2>, scalar_prefetch = 0 : i64, scratch_operands = 0 : i64, tpu.core_type = #tpu.core_type<tc>, window_params = [{transform_indices = @transform_0, window_bounds = array<i64: 1, 8, 32>}, {transform_indices = @transform_1, window_bounds = array<i64: 1, 8, 16>}, {transform_indices = @transform_2, window_bounds = array<i64: 1, 8, 16>}, {pipeline_mode = #tpu.pipeline_mode<synchronous>, transform_indices = @transform_3, window_bounds = array<i64: 8, 4>}, {pipeline_mode = #tpu.pipeline_mode<synchronous>, transform_indices = @transform_4, window_bounds = array<i64: 8, 4>}, {transform_indices = @transform_5, window_bounds = array<i64: 1, 8, 32>}]} {
    %c0 = arith.constant 0 : index
    %c0_0 = arith.constant 0 : index
    %c0_1 = arith.constant 0 : index
    %0 = vector.load %arg1[%c0, %c0_0, %c0_1] : memref<1x8x32xbf16, #tpu.memory_space<vmem>>, vector<1x8x32xbf16>
    %1 = vector.shape_cast %0 : vector<1x8x32xbf16> to vector<8x32xbf16>
    %c0_2 = arith.constant 0 : index
    %c0_3 = arith.constant 0 : index
    %c0_4 = arith.constant 0 : index
    %2 = vector.load %arg2[%c0_2, %c0_3, %c0_4] : memref<1x8x16xbf16, #tpu.memory_space<vmem>>, vector<1x8x16xbf16>
    %3 = vector.shape_cast %2 : vector<1x8x16xbf16> to vector<8x16xbf16>
    %c0_5 = arith.constant 0 : index
    %c0_6 = arith.constant 0 : index
    %c0_7 = arith.constant 0 : index
    %4 = vector.load %arg3[%c0_5, %c0_6, %c0_7] : memref<1x8x16xbf16, #tpu.memory_space<vmem>>, vector<1x8x16xbf16>
    %5 = vector.shape_cast %4 : vector<1x8x16xbf16> to vector<8x16xbf16>
    %c0_8 = arith.constant 0 : index
    %c0_9 = arith.constant 0 : index
    %6 = vector.load %arg4[%c0_8, %c0_9] : memref<8x4xf32, #tpu.memory_space<vmem>>, vector<8x4xf32>
    %c0_10 = arith.constant 0 : index
    %c0_11 = arith.constant 0 : index
    %7 = vector.load %arg5[%c0_10, %c0_11] : memref<8x4xf32, #tpu.memory_space<vmem>>, vector<8x4xf32>
    %8 = tpu.iota {dimensions = array<i32: 0>} : vector<8x8xi32>
    %9 = tpu.iota {dimensions = array<i32: 1>} : vector<8x8xi32>
    %10 = arith.cmpi sgt, %9, %8 : vector<8x8xi32>
    %11 = vector.extract_strided_slice %3 {offsets = [0, 0], sizes = [8, 8], strides = [1, 1]} : vector<8x16xbf16> to vector<8x8xbf16>
    %12 = arith.extf %11 : vector<8x8xbf16> to vector<8x8xf32>
    %13 = vector.extract_strided_slice %12 {offsets = [0, 0], sizes = [8, 4], strides = [1, 1]} : vector<8x8xf32> to vector<8x4xf32>
    %14 = vector.extract_strided_slice %12 {offsets = [0, 4], sizes = [8, 4], strides = [1, 1]} : vector<8x8xf32> to vector<8x4xf32>
    %15 = arith.mulf %13, %6 : vector<8x4xf32>
    %16 = arith.mulf %14, %7 : vector<8x4xf32>
    %17 = arith.subf %15, %16 : vector<8x4xf32>
    %18 = arith.mulf %13, %7 : vector<8x4xf32>
    %19 = arith.mulf %14, %6 : vector<8x4xf32>
    %20 = arith.addf %18, %19 : vector<8x4xf32>
    %21 = tpu.concatenate %17, %20 in 1 : vector<8x4xf32>, vector<8x4xf32> -> vector<8x8xf32>
    %22 = arith.truncf %21 : vector<8x8xf32> to vector<8x8xbf16>
    %23 = vector.extract_strided_slice %5 {offsets = [0, 0], sizes = [8, 8], strides = [1, 1]} : vector<8x16xbf16> to vector<8x8xbf16>
    %24 = vector.extract_strided_slice %1 {offsets = [0, 0], sizes = [8, 8], strides = [1, 1]} : vector<8x32xbf16> to vector<8x8xbf16>
    %25 = arith.extf %24 : vector<8x8xbf16> to vector<8x8xf32>
    %26 = vector.extract_strided_slice %25 {offsets = [0, 0], sizes = [8, 4], strides = [1, 1]} : vector<8x8xf32> to vector<8x4xf32>
    %27 = vector.extract_strided_slice %25 {offsets = [0, 4], sizes = [8, 4], strides = [1, 1]} : vector<8x8xf32> to vector<8x4xf32>
    %28 = arith.mulf %26, %6 : vector<8x4xf32>
    %29 = arith.mulf %27, %7 : vector<8x4xf32>
    %30 = arith.subf %28, %29 : vector<8x4xf32>
    %31 = arith.mulf %26, %7 : vector<8x4xf32>
    %32 = arith.mulf %27, %6 : vector<8x4xf32>
    %33 = arith.addf %31, %32 : vector<8x4xf32>
    %34 = tpu.concatenate %30, %33 in 1 : vector<8x4xf32>, vector<8x4xf32> -> vector<8x8xf32>
    %35 = arith.truncf %34 : vector<8x8xf32> to vector<8x8xbf16>
    %cst = arith.constant dense<0.000000e+00> : vector<8x8xf32>
    %36 = tpu.matmul %35, %22, %cst {dimension_numbers = #tpu.dot_dimension_numbers<[1], [1], [0], [0], [0, 0, 1, 0], [], []>} : vector<8x8xbf16>, vector<8x8xbf16>, vector<8x8xf32> -> vector<8x8xf32>
    %cst_12 = arith.constant 0.353553385 : f32
    %37 = vector.broadcast %cst_12 : f32 to vector<8x8xf32>
    %38 = arith.mulf %36, %37 : vector<8x8xf32>
    %cst_13 = arith.constant -1.000000e+30 : f32
    %39 = vector.broadcast %cst_13 : f32 to vector<8x8xf32>
    %40 = arith.select %10, %39, %38 : vector<8x8xi1>, vector<8x8xf32>
    %cst_14 = arith.constant dense<0xFF800000> : vector<8xf32>
    %41 = vector.multi_reduction <maximumf>, %40, %cst_14 [1] : vector<8x8xf32> to vector<8xf32>
    %42 = vector.shape_cast %41 : vector<8xf32> to vector<8x1xf32>
    %43 = vector.broadcast %42 : vector<8x1xf32> to vector<8x8xf32>
    %44 = arith.subf %40, %43 : vector<8x8xf32>
    %45 = math.exp %44 : vector<8x8xf32>
    %cst_15 = arith.constant dense<0.000000e+00> : vector<8xf32>
    %46 = vector.multi_reduction <add>, %45, %cst_15 [1] : vector<8x8xf32> to vector<8xf32>
    %47 = vector.shape_cast %46 : vector<8xf32> to vector<8x1xf32>
    %48 = tpu.reciprocal %47 : vector<8x1xf32> -> vector<8x1xf32>
    %49 = vector.broadcast %48 : vector<8x1xf32> to vector<8x8xf32>
    %50 = arith.mulf %45, %49 : vector<8x8xf32>
    %51 = arith.truncf %50 : vector<8x8xf32> to vector<8x8xbf16>
    %cst_16 = arith.constant dense<0.000000e+00> : vector<8x8xf32>
    %52 = tpu.matmul %51, %23, %cst_16 {dimension_numbers = #tpu.dot_dimension_numbers<[1], [0], [0], [1], [0, 0, 1, 1], [], []>} : vector<8x8xbf16>, vector<8x8xbf16>, vector<8x8xf32> -> vector<8x8xf32>
    %53 = vector.extract_strided_slice %1 {offsets = [0, 8], sizes = [8, 8], strides = [1, 1]} : vector<8x32xbf16> to vector<8x8xbf16>
    %54 = arith.extf %53 : vector<8x8xbf16> to vector<8x8xf32>
    %55 = vector.extract_strided_slice %54 {offsets = [0, 0], sizes = [8, 4], strides = [1, 1]} : vector<8x8xf32> to vector<8x4xf32>
    %56 = vector.extract_strided_slice %54 {offsets = [0, 4], sizes = [8, 4], strides = [1, 1]} : vector<8x8xf32> to vector<8x4xf32>
    %57 = arith.mulf %55, %6 : vector<8x4xf32>
    %58 = arith.mulf %56, %7 : vector<8x4xf32>
    %59 = arith.subf %57, %58 : vector<8x4xf32>
    %60 = arith.mulf %55, %7 : vector<8x4xf32>
    %61 = arith.mulf %56, %6 : vector<8x4xf32>
    %62 = arith.addf %60, %61 : vector<8x4xf32>
    %63 = tpu.concatenate %59, %62 in 1 : vector<8x4xf32>, vector<8x4xf32> -> vector<8x8xf32>
    %64 = arith.truncf %63 : vector<8x8xf32> to vector<8x8xbf16>
    %cst_17 = arith.constant dense<0.000000e+00> : vector<8x8xf32>
    %65 = tpu.matmul %64, %22, %cst_17 {dimension_numbers = #tpu.dot_dimension_numbers<[1], [1], [0], [0], [0, 0, 1, 0], [], []>} : vector<8x8xbf16>, vector<8x8xbf16>, vector<8x8xf32> -> vector<8x8xf32>
    %cst_18 = arith.constant 0.353553385 : f32
    %66 = vector.broadcast %cst_18 : f32 to vector<8x8xf32>
    %67 = arith.mulf %65, %66 : vector<8x8xf32>
    %cst_19 = arith.constant -1.000000e+30 : f32
    %68 = vector.broadcast %cst_19 : f32 to vector<8x8xf32>
    %69 = arith.select %10, %68, %67 : vector<8x8xi1>, vector<8x8xf32>
    %cst_20 = arith.constant dense<0xFF800000> : vector<8xf32>
    %70 = vector.multi_reduction <maximumf>, %69, %cst_20 [1] : vector<8x8xf32> to vector<8xf32>
    %71 = vector.shape_cast %70 : vector<8xf32> to vector<8x1xf32>
    %72 = vector.broadcast %71 : vector<8x1xf32> to vector<8x8xf32>
    %73 = arith.subf %69, %72 : vector<8x8xf32>
    %74 = math.exp %73 : vector<8x8xf32>
    %cst_21 = arith.constant dense<0.000000e+00> : vector<8xf32>
    %75 = vector.multi_reduction <add>, %74, %cst_21 [1] : vector<8x8xf32> to vector<8xf32>
    %76 = vector.shape_cast %75 : vector<8xf32> to vector<8x1xf32>
    %77 = tpu.reciprocal %76 : vector<8x1xf32> -> vector<8x1xf32>
    %78 = vector.broadcast %77 : vector<8x1xf32> to vector<8x8xf32>
    %79 = arith.mulf %74, %78 : vector<8x8xf32>
    %80 = arith.truncf %79 : vector<8x8xf32> to vector<8x8xbf16>
    %cst_22 = arith.constant dense<0.000000e+00> : vector<8x8xf32>
    %81 = tpu.matmul %80, %23, %cst_22 {dimension_numbers = #tpu.dot_dimension_numbers<[1], [0], [0], [1], [0, 0, 1, 1], [], []>} : vector<8x8xbf16>, vector<8x8xbf16>, vector<8x8xf32> -> vector<8x8xf32>
    %82 = vector.extract_strided_slice %3 {offsets = [0, 8], sizes = [8, 8], strides = [1, 1]} : vector<8x16xbf16> to vector<8x8xbf16>
    %83 = arith.extf %82 : vector<8x8xbf16> to vector<8x8xf32>
    %84 = vector.extract_strided_slice %83 {offsets = [0, 0], sizes = [8, 4], strides = [1, 1]} : vector<8x8xf32> to vector<8x4xf32>
    %85 = vector.extract_strided_slice %83 {offsets = [0, 4], sizes = [8, 4], strides = [1, 1]} : vector<8x8xf32> to vector<8x4xf32>
    %86 = arith.mulf %84, %6 : vector<8x4xf32>
    %87 = arith.mulf %85, %7 : vector<8x4xf32>
    %88 = arith.subf %86, %87 : vector<8x4xf32>
    %89 = arith.mulf %84, %7 : vector<8x4xf32>
    %90 = arith.mulf %85, %6 : vector<8x4xf32>
    %91 = arith.addf %89, %90 : vector<8x4xf32>
    %92 = tpu.concatenate %88, %91 in 1 : vector<8x4xf32>, vector<8x4xf32> -> vector<8x8xf32>
    %93 = arith.truncf %92 : vector<8x8xf32> to vector<8x8xbf16>
    %94 = vector.extract_strided_slice %5 {offsets = [0, 8], sizes = [8, 8], strides = [1, 1]} : vector<8x16xbf16> to vector<8x8xbf16>
    %95 = vector.extract_strided_slice %1 {offsets = [0, 16], sizes = [8, 8], strides = [1, 1]} : vector<8x32xbf16> to vector<8x8xbf16>
    %96 = arith.extf %95 : vector<8x8xbf16> to vector<8x8xf32>
    %97 = vector.extract_strided_slice %96 {offsets = [0, 0], sizes = [8, 4], strides = [1, 1]} : vector<8x8xf32> to vector<8x4xf32>
    %98 = vector.extract_strided_slice %96 {offsets = [0, 4], sizes = [8, 4], strides = [1, 1]} : vector<8x8xf32> to vector<8x4xf32>
    %99 = arith.mulf %97, %6 : vector<8x4xf32>
    %100 = arith.mulf %98, %7 : vector<8x4xf32>
    %101 = arith.subf %99, %100 : vector<8x4xf32>
    %102 = arith.mulf %97, %7 : vector<8x4xf32>
    %103 = arith.mulf %98, %6 : vector<8x4xf32>
    %104 = arith.addf %102, %103 : vector<8x4xf32>
    %105 = tpu.concatenate %101, %104 in 1 : vector<8x4xf32>, vector<8x4xf32> -> vector<8x8xf32>
    %106 = arith.truncf %105 : vector<8x8xf32> to vector<8x8xbf16>
    %cst_23 = arith.constant dense<0.000000e+00> : vector<8x8xf32>
    %107 = tpu.matmul %106, %93, %cst_23 {dimension_numbers = #tpu.dot_dimension_numbers<[1], [1], [0], [0], [0, 0, 1, 0], [], []>} : vector<8x8xbf16>, vector<8x8xbf16>, vector<8x8xf32> -> vector<8x8xf32>
    %cst_24 = arith.constant 0.353553385 : f32
    %108 = vector.broadcast %cst_24 : f32 to vector<8x8xf32>
    %109 = arith.mulf %107, %108 : vector<8x8xf32>
    %cst_25 = arith.constant -1.000000e+30 : f32
    %110 = vector.broadcast %cst_25 : f32 to vector<8x8xf32>
    %111 = arith.select %10, %110, %109 : vector<8x8xi1>, vector<8x8xf32>
    %cst_26 = arith.constant dense<0xFF800000> : vector<8xf32>
    %112 = vector.multi_reduction <maximumf>, %111, %cst_26 [1] : vector<8x8xf32> to vector<8xf32>
    %113 = vector.shape_cast %112 : vector<8xf32> to vector<8x1xf32>
    %114 = vector.broadcast %113 : vector<8x1xf32> to vector<8x8xf32>
    %115 = arith.subf %111, %114 : vector<8x8xf32>
    %116 = math.exp %115 : vector<8x8xf32>
    %cst_27 = arith.constant dense<0.000000e+00> : vector<8xf32>
    %117 = vector.multi_reduction <add>, %116, %cst_27 [1] : vector<8x8xf32> to vector<8xf32>
    %118 = vector.shape_cast %117 : vector<8xf32> to vector<8x1xf32>
    %119 = tpu.reciprocal %118 : vector<8x1xf32> -> vector<8x1xf32>
    %120 = vector.broadcast %119 : vector<8x1xf32> to vector<8x8xf32>
    %121 = arith.mulf %116, %120 : vector<8x8xf32>
    %122 = arith.truncf %121 : vector<8x8xf32> to vector<8x8xbf16>
    %cst_28 = arith.constant dense<0.000000e+00> : vector<8x8xf32>
    %123 = tpu.matmul %122, %94, %cst_28 {dimension_numbers = #tpu.dot_dimension_numbers<[1], [0], [0], [1], [0, 0, 1, 1], [], []>} : vector<8x8xbf16>, vector<8x8xbf16>, vector<8x8xf32> -> vector<8x8xf32>
    %124 = vector.extract_strided_slice %1 {offsets = [0, 24], sizes = [8, 8], strides = [1, 1]} : vector<8x32xbf16> to vector<8x8xbf16>
    %125 = arith.extf %124 : vector<8x8xbf16> to vector<8x8xf32>
    %126 = vector.extract_strided_slice %125 {offsets = [0, 0], sizes = [8, 4], strides = [1, 1]} : vector<8x8xf32> to vector<8x4xf32>
    %127 = vector.extract_strided_slice %125 {offsets = [0, 4], sizes = [8, 4], strides = [1, 1]} : vector<8x8xf32> to vector<8x4xf32>
    %128 = arith.mulf %126, %6 : vector<8x4xf32>
    %129 = arith.mulf %127, %7 : vector<8x4xf32>
    %130 = arith.subf %128, %129 : vector<8x4xf32>
    %131 = arith.mulf %126, %7 : vector<8x4xf32>
    %132 = arith.mulf %127, %6 : vector<8x4xf32>
    %133 = arith.addf %131, %132 : vector<8x4xf32>
    %134 = tpu.concatenate %130, %133 in 1 : vector<8x4xf32>, vector<8x4xf32> -> vector<8x8xf32>
    %135 = arith.truncf %134 : vector<8x8xf32> to vector<8x8xbf16>
    %cst_29 = arith.constant dense<0.000000e+00> : vector<8x8xf32>
    %136 = tpu.matmul %135, %93, %cst_29 {dimension_numbers = #tpu.dot_dimension_numbers<[1], [1], [0], [0], [0, 0, 1, 0], [], []>} : vector<8x8xbf16>, vector<8x8xbf16>, vector<8x8xf32> -> vector<8x8xf32>
    %cst_30 = arith.constant 0.353553385 : f32
    %137 = vector.broadcast %cst_30 : f32 to vector<8x8xf32>
    %138 = arith.mulf %136, %137 : vector<8x8xf32>
    %cst_31 = arith.constant -1.000000e+30 : f32
    %139 = vector.broadcast %cst_31 : f32 to vector<8x8xf32>
    %140 = arith.select %10, %139, %138 : vector<8x8xi1>, vector<8x8xf32>
    %cst_32 = arith.constant dense<0xFF800000> : vector<8xf32>
    %141 = vector.multi_reduction <maximumf>, %140, %cst_32 [1] : vector<8x8xf32> to vector<8xf32>
    %142 = vector.shape_cast %141 : vector<8xf32> to vector<8x1xf32>
    %143 = vector.broadcast %142 : vector<8x1xf32> to vector<8x8xf32>
    %144 = arith.subf %140, %143 : vector<8x8xf32>
    %145 = math.exp %144 : vector<8x8xf32>
    %cst_33 = arith.constant dense<0.000000e+00> : vector<8xf32>
    %146 = vector.multi_reduction <add>, %145, %cst_33 [1] : vector<8x8xf32> to vector<8xf32>
    %147 = vector.shape_cast %146 : vector<8xf32> to vector<8x1xf32>
    %148 = tpu.reciprocal %147 : vector<8x1xf32> -> vector<8x1xf32>
    %149 = vector.broadcast %148 : vector<8x1xf32> to vector<8x8xf32>
    %150 = arith.mulf %145, %149 : vector<8x8xf32>
    %151 = arith.truncf %150 : vector<8x8xf32> to vector<8x8xbf16>
    %cst_34 = arith.constant dense<0.000000e+00> : vector<8x8xf32>
    %152 = tpu.matmul %151, %94, %cst_34 {dimension_numbers = #tpu.dot_dimension_numbers<[1], [0], [0], [1], [0, 0, 1, 1], [], []>} : vector<8x8xbf16>, vector<8x8xbf16>, vector<8x8xf32> -> vector<8x8xf32>
    %153 = tpu.concatenate %52, %81, %123, %152 in 1 : vector<8x8xf32>, vector<8x8xf32>, vector<8x8xf32>, vector<8x8xf32> -> vector<8x32xf32>
    %154 = arith.truncf %153 : vector<8x32xf32> to vector<8x32xbf16>
    %c0_35 = arith.constant 0 : index
    %c0_36 = arith.constant 0 : index
    %c0_37 = arith.constant 0 : index
    %155 = vector.load %arg6[%c0_35, %c0_36, %c0_37] : memref<1x8x32xbf16, #tpu.memory_space<vmem>>, vector<1x8x32xbf16>
    %156 = vector.shape_cast %155 : vector<1x8x32xbf16> to vector<8x32xbf16>
    %157 = vector.shape_cast %154 : vector<8x32xbf16> to vector<1x8x32xbf16>
    tpu.vector_store %arg6[%c0_35, %c0_36, %c0_37], %157 {strides = array<i32>} : memref<1x8x32xbf16, #tpu.memory_space<vmem>>, vector<1x8x32xbf16>,
    return
  }
  func.func @transform_0(%arg0: i32) -> (i32, i32, i32) {
    %c0_i32 = arith.constant 0 : i32
    %c0_i32_0 = arith.constant 0 : i32
    %c0_i32_1 = arith.constant 0 : i32
    return %arg0, %c0_i32, %c0_i32_0 : i32, i32, i32
  }
  func.func @transform_1(%arg0: i32) -> (i32, i32, i32) {
    %c0_i32 = arith.constant 0 : i32
    %c0_i32_0 = arith.constant 0 : i32
    %c0_i32_1 = arith.constant 0 : i32
    return %arg0, %c0_i32, %c0_i32_0 : i32, i32, i32
  }
  func.func @transform_2(%arg0: i32) -> (i32, i32, i32) {
    %c0_i32 = arith.constant 0 : i32
    %c0_i32_0 = arith.constant 0 : i32
    %c0_i32_1 = arith.constant 0 : i32
    return %arg0, %c0_i32, %c0_i32_0 : i32, i32, i32
  }
  func.func @transform_3(%arg0: i32) -> (i32, i32) {
    %c0_i32 = arith.constant 0 : i32
    %c0_i32_0 = arith.constant 0 : i32
    %c0_i32_1 = arith.constant 0 : i32
    return %c0_i32, %c0_i32_0 : i32, i32
  }
  func.func @transform_4(%arg0: i32) -> (i32, i32) {
    %c0_i32 = arith.constant 0 : i32
    %c0_i32_0 = arith.constant 0 : i32
    %c0_i32_1 = arith.constant 0 : i32
    return %c0_i32, %c0_i32_0 : i32, i32
  }
  func.func @transform_5(%arg0: i32) -> (i32, i32, i32) {
    %c0_i32 = arith.constant 0 : i32
    %c0_i32_0 = arith.constant 0 : i32
    %c0_i32_1 = arith.constant 0 : i32
    return %arg0, %c0_i32, %c0_i32_0 : i32, i32, i32
  }
}

module attributes {stable_mosaic.version = 11 : i64} {
  func.func @_dense_kernel(%arg0: i32, %arg1: i32, %arg2: i32, %arg3: memref<16x32xbf16, #tpu.memory_space<vmem>>, %arg4: memref<32x32xbf16, #tpu.memory_space<vmem>>, %arg5: memref<1x32xf32, #tpu.memory_space<vmem>>, %arg6: memref<16x32xf32, #tpu.memory_space<vmem>>, %arg7: memref<16x32xf32, #tpu.memory_space<vmem>>) attributes {dimension_semantics = [#tpu.dimension_semantics<parallel>, #tpu.dimension_semantics<parallel>, #tpu.dimension_semantics<arbitrary>], iteration_bounds = array<i64: 1, 1, 1>, scalar_prefetch = 0 : i64, scratch_operands = 0 : i64, tpu.core_type = #tpu.core_type<tc>, window_params = [{transform_indices = @transform_0, window_bounds = array<i64: 16, 32>}, {transform_indices = @transform_1, window_bounds = array<i64: 32, 32>}, {transform_indices = @transform_2, window_bounds = array<i64: 1, 32>}, {transform_indices = @transform_3, window_bounds = array<i64: 16, 32>}, {transform_indices = @transform_4, window_bounds = array<i64: 16, 32>}]} {
    %c0 = arith.constant 0 : index
    %c0_0 = arith.constant 0 : index
    %0 = vector.load %arg3[%c0, %c0_0] : memref<16x32xbf16, #tpu.memory_space<vmem>>, vector<16x32xbf16>
    %c0_1 = arith.constant 0 : index
    %c0_2 = arith.constant 0 : index
    %1 = vector.load %arg4[%c0_1, %c0_2] : memref<32x32xbf16, #tpu.memory_space<vmem>>, vector<32x32xbf16>
    %cst = arith.constant dense<0.000000e+00> : vector<16x32xf32>
    %2 = tpu.matmul %0, %1, %cst {dimension_numbers = #tpu.dot_dimension_numbers<[1], [0], [0], [1], [0, 0, 1, 1], [], []>} : vector<16x32xbf16>, vector<32x32xbf16>, vector<16x32xf32> -> vector<16x32xf32>
    %c0_3 = arith.constant 0 : index
    %c0_4 = arith.constant 0 : index
    %3 = vector.load %arg5[%c0_3, %c0_4] : memref<1x32xf32, #tpu.memory_space<vmem>>, vector<1x32xf32>
    %4 = vector.broadcast %3 : vector<1x32xf32> to vector<16x32xf32>
    %5 = arith.addf %2, %4 : vector<16x32xf32>
    %c0_5 = arith.constant 0 : index
    %c0_6 = arith.constant 0 : index
    %6 = vector.load %arg6[%c0_5, %c0_6] : memref<16x32xf32, #tpu.memory_space<vmem>>, vector<16x32xf32>
    %7 = arith.addf %5, %6 : vector<16x32xf32>
    %c0_7 = arith.constant 0 : index
    %c0_8 = arith.constant 0 : index
    %8 = vector.load %arg7[%c0_7, %c0_8] : memref<16x32xf32, #tpu.memory_space<vmem>>, vector<16x32xf32>
    tpu.vector_store %arg7[%c0_7, %c0_8], %7 {strides = array<i32>} : memref<16x32xf32, #tpu.memory_space<vmem>>, vector<16x32xf32>,
    return
  }
  func.func @transform_0(%arg0: i32, %arg1: i32, %arg2: i32) -> (i32, i32) {
    %c0_i32 = arith.constant 0 : i32
    return %arg0, %arg2 : i32, i32
  }
  func.func @transform_1(%arg0: i32, %arg1: i32, %arg2: i32) -> (i32, i32) {
    %c0_i32 = arith.constant 0 : i32
    return %arg2, %arg1 : i32, i32
  }
  func.func @transform_2(%arg0: i32, %arg1: i32, %arg2: i32) -> (i32, i32) {
    %c0_i32 = arith.constant 0 : i32
    %c0_i32_0 = arith.constant 0 : i32
    return %c0_i32, %arg1 : i32, i32
  }
  func.func @transform_3(%arg0: i32, %arg1: i32, %arg2: i32) -> (i32, i32) {
    %c0_i32 = arith.constant 0 : i32
    return %arg0, %arg1 : i32, i32
  }
  func.func @transform_4(%arg0: i32, %arg1: i32, %arg2: i32) -> (i32, i32) {
    %c0_i32 = arith.constant 0 : i32
    return %arg0, %arg1 : i32, i32
  }
}

module attributes {stable_mosaic.version = 11 : i64} {
  func.func @_ln_kernel(%arg0: i32, %arg1: memref<16x32xf32, #tpu.memory_space<vmem>>, %arg2: memref<1x32xf32, #tpu.memory_space<vmem>>, %arg3: memref<1x32xf32, #tpu.memory_space<vmem>>, %arg4: memref<16x32xf32, #tpu.memory_space<vmem>>) attributes {dimension_semantics = [#tpu.dimension_semantics<parallel>], iteration_bounds = array<i64: 1>, scalar_prefetch = 0 : i64, scratch_operands = 0 : i64, tpu.core_type = #tpu.core_type<tc>, window_params = [{transform_indices = @transform_0, window_bounds = array<i64: 16, 32>}, {pipeline_mode = #tpu.pipeline_mode<synchronous>, transform_indices = @transform_1, window_bounds = array<i64: 1, 32>}, {pipeline_mode = #tpu.pipeline_mode<synchronous>, transform_indices = @transform_2, window_bounds = array<i64: 1, 32>}, {transform_indices = @transform_3, window_bounds = array<i64: 16, 32>}]} {
    %c0 = arith.constant 0 : index
    %c0_0 = arith.constant 0 : index
    %0 = vector.load %arg1[%c0, %c0_0] : memref<16x32xf32, #tpu.memory_space<vmem>>, vector<16x32xf32>
    %cst = arith.constant dense<0.000000e+00> : vector<16xf32>
    %1 = vector.multi_reduction <add>, %0, %cst [1] : vector<16x32xf32> to vector<16xf32>
    %2 = vector.shape_cast %1 : vector<16xf32> to vector<16x1xf32>
    %cst_1 = arith.constant 3.200000e+01 : f32
    %3 = vector.broadcast %cst_1 : f32 to vector<16x1xf32>
    %4 = arith.divf %2, %3 : vector<16x1xf32>
    %5 = vector.broadcast %4 : vector<16x1xf32> to vector<16x32xf32>
    %6 = arith.subf %0, %5 : vector<16x32xf32>
    %7 = arith.mulf %6, %6 : vector<16x32xf32>
    %cst_2 = arith.constant dense<0.000000e+00> : vector<16xf32>
    %8 = vector.multi_reduction <add>, %7, %cst_2 [1] : vector<16x32xf32> to vector<16xf32>
    %9 = vector.shape_cast %8 : vector<16xf32> to vector<16x1xf32>
    %cst_3 = arith.constant 3.200000e+01 : f32
    %10 = vector.broadcast %cst_3 : f32 to vector<16x1xf32>
    %11 = arith.divf %9, %10 : vector<16x1xf32>
    %12 = vector.broadcast %4 : vector<16x1xf32> to vector<16x32xf32>
    %13 = arith.subf %0, %12 : vector<16x32xf32>
    %cst_4 = arith.constant 9.99999974E-6 : f32
    %14 = vector.broadcast %cst_4 : f32 to vector<16x1xf32>
    %15 = arith.addf %11, %14 : vector<16x1xf32>
    %16 = math.rsqrt %15 : vector<16x1xf32>
    %17 = vector.broadcast %16 : vector<16x1xf32> to vector<16x32xf32>
    %18 = arith.mulf %13, %17 : vector<16x32xf32>
    %c0_5 = arith.constant 0 : index
    %c0_6 = arith.constant 0 : index
    %19 = vector.load %arg2[%c0_5, %c0_6] : memref<1x32xf32, #tpu.memory_space<vmem>>, vector<1x32xf32>
    %20 = vector.broadcast %19 : vector<1x32xf32> to vector<16x32xf32>
    %21 = arith.mulf %18, %20 : vector<16x32xf32>
    %c0_7 = arith.constant 0 : index
    %c0_8 = arith.constant 0 : index
    %22 = vector.load %arg3[%c0_7, %c0_8] : memref<1x32xf32, #tpu.memory_space<vmem>>, vector<1x32xf32>
    %23 = vector.broadcast %22 : vector<1x32xf32> to vector<16x32xf32>
    %24 = arith.addf %21, %23 : vector<16x32xf32>
    %c0_9 = arith.constant 0 : index
    %c0_10 = arith.constant 0 : index
    %25 = vector.load %arg4[%c0_9, %c0_10] : memref<16x32xf32, #tpu.memory_space<vmem>>, vector<16x32xf32>
    tpu.vector_store %arg4[%c0_9, %c0_10], %24 {strides = array<i32>} : memref<16x32xf32, #tpu.memory_space<vmem>>, vector<16x32xf32>,
    return
  }
  func.func @transform_0(%arg0: i32) -> (i32, i32) {
    %c0_i32 = arith.constant 0 : i32
    %c0_i32_0 = arith.constant 0 : i32
    return %arg0, %c0_i32 : i32, i32
  }
  func.func @transform_1(%arg0: i32) -> (i32, i32) {
    %c0_i32 = arith.constant 0 : i32
    %c0_i32_0 = arith.constant 0 : i32
    %c0_i32_1 = arith.constant 0 : i32
    return %c0_i32, %c0_i32_0 : i32, i32
  }
  func.func @transform_2(%arg0: i32) -> (i32, i32) {
    %c0_i32 = arith.constant 0 : i32
    %c0_i32_0 = arith.constant 0 : i32
    %c0_i32_1 = arith.constant 0 : i32
    return %c0_i32, %c0_i32_0 : i32, i32
  }
  func.func @transform_3(%arg0: i32) -> (i32, i32) {
    %c0_i32 = arith.constant 0 : i32
    %c0_i32_0 = arith.constant 0 : i32
    return %arg0, %c0_i32 : i32, i32
  }
}

module attributes {stable_mosaic.version = 11 : i64} {
  func.func @_dense_kernel(%arg0: i32, %arg1: i32, %arg2: i32, %arg3: memref<16x32xf32, #tpu.memory_space<vmem>>, %arg4: memref<32x4xbf16, #tpu.memory_space<vmem>>, %arg5: memref<16x4xf32, #tpu.memory_space<vmem>>) attributes {dimension_semantics = [#tpu.dimension_semantics<parallel>, #tpu.dimension_semantics<parallel>, #tpu.dimension_semantics<arbitrary>], iteration_bounds = array<i64: 1, 1, 1>, scalar_prefetch = 0 : i64, scratch_operands = 0 : i64, tpu.core_type = #tpu.core_type<tc>, window_params = [{transform_indices = @transform_0, window_bounds = array<i64: 16, 32>}, {transform_indices = @transform_1, window_bounds = array<i64: 32, 4>}, {transform_indices = @transform_2, window_bounds = array<i64: 16, 4>}]} {
    %c0 = arith.constant 0 : index
    %c0_0 = arith.constant 0 : index
    %0 = vector.load %arg3[%c0, %c0_0] : memref<16x32xf32, #tpu.memory_space<vmem>>, vector<16x32xf32>
    %1 = arith.truncf %0 : vector<16x32xf32> to vector<16x32xbf16>
    %c0_1 = arith.constant 0 : index
    %c0_2 = arith.constant 0 : index
    %2 = vector.load %arg4[%c0_1, %c0_2] : memref<32x4xbf16, #tpu.memory_space<vmem>>, vector<32x4xbf16>
    %cst = arith.constant dense<0.000000e+00> : vector<16x4xf32>
    %3 = tpu.matmul %1, %2, %cst {dimension_numbers = #tpu.dot_dimension_numbers<[1], [0], [0], [1], [0, 0, 1, 1], [], []>} : vector<16x32xbf16>, vector<32x4xbf16>, vector<16x4xf32> -> vector<16x4xf32>
    %c0_3 = arith.constant 0 : index
    %c0_4 = arith.constant 0 : index
    %4 = vector.load %arg5[%c0_3, %c0_4] : memref<16x4xf32, #tpu.memory_space<vmem>>, vector<16x4xf32>
    tpu.vector_store %arg5[%c0_3, %c0_4], %3 {strides = array<i32>} : memref<16x4xf32, #tpu.memory_space<vmem>>, vector<16x4xf32>,
    return
  }
  func.func @transform_0(%arg0: i32, %arg1: i32, %arg2: i32) -> (i32, i32) {
    %c0_i32 = arith.constant 0 : i32
    return %arg0, %arg2 : i32, i32
  }
  func.func @transform_1(%arg0: i32, %arg1: i32, %arg2: i32) -> (i32, i32) {
    %c0_i32 = arith.constant 0 : i32
    return %arg2, %arg1 : i32, i32
  }
  func.func @transform_2(%arg0: i32, %arg1: i32, %arg2: i32) -> (i32, i32) {
    %c0_i32 = arith.constant 0 : i32
    return %arg0, %arg1 : i32, i32
  }
}

module attributes {stable_mosaic.version = 11 : i64} {
  func.func @_dense_kernel(%arg0: i32, %arg1: i32, %arg2: i32, %arg3: memref<2x32xf32, #tpu.memory_space<vmem>>, %arg4: memref<32x128xbf16, #tpu.memory_space<vmem>>, %arg5: memref<2x128xf32, #tpu.memory_space<vmem>>) attributes {dimension_semantics = [#tpu.dimension_semantics<parallel>, #tpu.dimension_semantics<parallel>, #tpu.dimension_semantics<arbitrary>], iteration_bounds = array<i64: 1, 1, 1>, scalar_prefetch = 0 : i64, scratch_operands = 0 : i64, tpu.core_type = #tpu.core_type<tc>, window_params = [{transform_indices = @transform_0, window_bounds = array<i64: 2, 32>}, {transform_indices = @transform_1, window_bounds = array<i64: 32, 128>}, {transform_indices = @transform_2, window_bounds = array<i64: 2, 128>}]} {
    %c0 = arith.constant 0 : index
    %c0_0 = arith.constant 0 : index
    %0 = vector.load %arg3[%c0, %c0_0] : memref<2x32xf32, #tpu.memory_space<vmem>>, vector<2x32xf32>
    %1 = arith.truncf %0 : vector<2x32xf32> to vector<2x32xbf16>
    %c0_1 = arith.constant 0 : index
    %c0_2 = arith.constant 0 : index
    %2 = vector.load %arg4[%c0_1, %c0_2] : memref<32x128xbf16, #tpu.memory_space<vmem>>, vector<32x128xbf16>
    %cst = arith.constant dense<0.000000e+00> : vector<2x128xf32>
    %3 = tpu.matmul %1, %2, %cst {dimension_numbers = #tpu.dot_dimension_numbers<[1], [0], [0], [1], [0, 0, 1, 1], [], []>} : vector<2x32xbf16>, vector<32x128xbf16>, vector<2x128xf32> -> vector<2x128xf32>
    %c0_3 = arith.constant 0 : index
    %c0_4 = arith.constant 0 : index
    %4 = vector.load %arg5[%c0_3, %c0_4] : memref<2x128xf32, #tpu.memory_space<vmem>>, vector<2x128xf32>
    tpu.vector_store %arg5[%c0_3, %c0_4], %3 {strides = array<i32>} : memref<2x128xf32, #tpu.memory_space<vmem>>, vector<2x128xf32>,
    return
  }
  func.func @transform_0(%arg0: i32, %arg1: i32, %arg2: i32) -> (i32, i32) {
    %c0_i32 = arith.constant 0 : i32
    return %arg0, %arg2 : i32, i32
  }
  func.func @transform_1(%arg0: i32, %arg1: i32, %arg2: i32) -> (i32, i32) {
    %c0_i32 = arith.constant 0 : i32
    return %arg2, %arg1 : i32, i32
  }
  func.func @transform_2(%arg0: i32, %arg1: i32, %arg2: i32) -> (i32, i32) {
    %c0_i32 = arith.constant 0 : i32
    return %arg0, %arg1 : i32, i32
  }
}

module attributes {stable_mosaic.version = 11 : i64} {
  func.func @_moe_kernel(%arg0: i32, %arg1: i32, %arg2: i32, %arg3: memref<16x32xf32, #tpu.memory_space<vmem>>, %arg4: memref<16x4xf32, #tpu.memory_space<vmem>>, %arg5: memref<1x32x128xbf16, #tpu.memory_space<vmem>>, %arg6: memref<1x1x128xf32, #tpu.memory_space<vmem>>, %arg7: memref<1x128x32xbf16, #tpu.memory_space<vmem>>, %arg8: memref<1x1x32xf32, #tpu.memory_space<vmem>>, %arg9: memref<16x32xf32, #tpu.memory_space<vmem>>) attributes {dimension_semantics = [#tpu.dimension_semantics<parallel>, #tpu.dimension_semantics<arbitrary>, #tpu.dimension_semantics<arbitrary>], iteration_bounds = array<i64: 1, 4, 1>, scalar_prefetch = 0 : i64, scratch_operands = 0 : i64, tpu.core_type = #tpu.core_type<tc>, window_params = [{transform_indices = @transform_0, window_bounds = array<i64: 16, 32>}, {transform_indices = @transform_1, window_bounds = array<i64: 16, 4>}, {transform_indices = @transform_2, window_bounds = array<i64: 1, 32, 128>}, {transform_indices = @transform_3, window_bounds = array<i64: 1, 1, 128>}, {transform_indices = @transform_4, window_bounds = array<i64: 1, 128, 32>}, {transform_indices = @transform_5, window_bounds = array<i64: 1, 1, 32>}, {transform_indices = @transform_6, window_bounds = array<i64: 16, 32>}]} {
    %c0_i32 = arith.constant 0 : i32
    %0 = arith.cmpi eq, %arg1, %c0_i32 : i32
    %c0_i32_0 = arith.constant 0 : i32
    %1 = arith.cmpi eq, %arg2, %c0_i32_0 : i32
    %2 = arith.andi %0, %1 : i1
    %3 = arith.extui %2 : i1 to i32
    %c0_i32_1 = arith.constant 0 : i32
    %4 = arith.cmpi ne, %3, %c0_i32_1 : i32
    scf.if %4 {
      %cst_26 = arith.constant 0.000000e+00 : f32
      %42 = vector.broadcast %cst_26 : f32 to vector<16x32xf32>
      %c0_27 = arith.constant 0 : index
      %c0_28 = arith.constant 0 : index
      %43 = vector.load %arg9[%c0_27, %c0_28] : memref<16x32xf32, #tpu.memory_space<vmem>>, vector<16x32xf32>
      tpu.vector_store %arg9[%c0_27, %c0_28], %42 {strides = array<i32>} : memref<16x32xf32, #tpu.memory_space<vmem>>, vector<16x32xf32>,
    } else {
    }
    %c0 = arith.constant 0 : index
    %c0_2 = arith.constant 0 : index
    %5 = vector.load %arg3[%c0, %c0_2] : memref<16x32xf32, #tpu.memory_space<vmem>>, vector<16x32xf32>
    %6 = arith.truncf %5 : vector<16x32xf32> to vector<16x32xbf16>
    %c0_3 = arith.constant 0 : index
    %c0_4 = arith.constant 0 : index
    %c0_5 = arith.constant 0 : index
    %7 = vector.load %arg5[%c0_3, %c0_4, %c0_5] : memref<1x32x128xbf16, #tpu.memory_space<vmem>>, vector<1x32x128xbf16>
    %8 = vector.shape_cast %7 : vector<1x32x128xbf16> to vector<32x128xbf16>
    %cst = arith.constant dense<0.000000e+00> : vector<16x128xf32>
    %9 = tpu.matmul %6, %8, %cst {dimension_numbers = #tpu.dot_dimension_numbers<[1], [0], [0], [1], [0, 0, 1, 1], [], []>} : vector<16x32xbf16>, vector<32x128xbf16>, vector<16x128xf32> -> vector<16x128xf32>
    %c0_6 = arith.constant 0 : index
    %c0_7 = arith.constant 0 : index
    %c0_8 = arith.constant 0 : index
    %10 = vector.load %arg6[%c0_6, %c0_7, %c0_8] : memref<1x1x128xf32, #tpu.memory_space<vmem>>, vector<1x1x128xf32>
    %11 = vector.shape_cast %10 : vector<1x1x128xf32> to vector<1x128xf32>
    %12 = vector.broadcast %11 : vector<1x128xf32> to vector<16x128xf32>
    %13 = arith.addf %9, %12 : vector<16x128xf32>
    %cst_9 = arith.constant 5.000000e-01 : f32
    %14 = vector.broadcast %cst_9 : f32 to vector<16x128xf32>
    %15 = arith.mulf %14, %13 : vector<16x128xf32>
    %cst_10 = arith.constant 0.707106769 : f32
    %16 = vector.broadcast %cst_10 : f32 to vector<16x128xf32>
    %17 = arith.mulf %13, %16 : vector<16x128xf32>
    %18 = math.erf %17 : vector<16x128xf32>
    %cst_11 = arith.constant 1.000000e+00 : f32
    %19 = vector.broadcast %cst_11 : f32 to vector<16x128xf32>
    %20 = arith.addf %19, %18 : vector<16x128xf32>
    %21 = arith.mulf %15, %20 : vector<16x128xf32>
    %22 = arith.truncf %21 : vector<16x128xf32> to vector<16x128xbf16>
    %c0_12 = arith.constant 0 : index
    %c0_13 = arith.constant 0 : index
    %c0_14 = arith.constant 0 : index
    %23 = vector.load %arg7[%c0_12, %c0_13, %c0_14] : memref<1x128x32xbf16, #tpu.memory_space<vmem>>, vector<1x128x32xbf16>
    %24 = vector.shape_cast %23 : vector<1x128x32xbf16> to vector<128x32xbf16>
    %cst_15 = arith.constant dense<0.000000e+00> : vector<16x32xf32>
    %25 = tpu.matmul %22, %24, %cst_15 {dimension_numbers = #tpu.dot_dimension_numbers<[1], [0], [0], [1], [0, 0, 1, 1], [], []>} : vector<16x128xbf16>, vector<128x32xbf16>, vector<16x32xf32> -> vector<16x32xf32>
    %c0_16 = arith.constant 0 : index
    %c0_17 = arith.constant 0 : index
    %26 = vector.load %arg4[%c0_16, %c0_17] : memref<16x4xf32, #tpu.memory_space<vmem>>, vector<16x4xf32>
    %27 = tpu.iota {dimensions = array<i32: 1>} : vector<16x4xi32>
    %28 = vector.broadcast %arg1 : i32 to vector<16x4xi32>
    %29 = arith.cmpi eq, %27, %28 : vector<16x4xi32>
    %cst_18 = arith.constant 0.000000e+00 : f32
    %30 = vector.broadcast %cst_18 : f32 to vector<16x4xf32>
    %31 = arith.select %29, %26, %30 : vector<16x4xi1>, vector<16x4xf32>
    %cst_19 = arith.constant dense<0.000000e+00> : vector<16xf32>
    %32 = vector.multi_reduction <add>, %31, %cst_19 [1] : vector<16x4xf32> to vector<16xf32>
    %33 = vector.shape_cast %32 : vector<16xf32> to vector<16x1xf32>
    %c0_i32_20 = arith.constant 0 : i32
    %34 = arith.cmpi eq, %arg2, %c0_i32_20 : i32
    %35 = arith.extui %34 : i1 to i32
    %c0_i32_21 = arith.constant 0 : i32
    %36 = arith.cmpi ne, %35, %c0_i32_21 : i32
    scf.if %36 {
      %c0_26 = arith.constant 0 : index
      %c0_27 = arith.constant 0 : index
      %42 = vector.load %arg9[%c0_26, %c0_27] : memref<16x32xf32, #tpu.memory_space<vmem>>, vector<16x32xf32>
      %c0_28 = arith.constant 0 : index
      %c0_29 = arith.constant 0 : index
      %c0_30 = arith.constant 0 : index
      %43 = vector.load %arg8[%c0_28, %c0_29, %c0_30] : memref<1x1x32xf32, #tpu.memory_space<vmem>>, vector<1x1x32xf32>
      %44 = vector.shape_cast %43 : vector<1x1x32xf32> to vector<1x32xf32>
      %45 = vector.broadcast %33 : vector<16x1xf32> to vector<16x32xf32>
      %46 = vector.broadcast %44 : vector<1x32xf32> to vector<16x32xf32>
      %47 = arith.mulf %45, %46 : vector<16x32xf32>
      %48 = arith.addf %42, %47 : vector<16x32xf32>
      %c0_31 = arith.constant 0 : index
      %c0_32 = arith.constant 0 : index
      %49 = vector.load %arg9[%c0_31, %c0_32] : memref<16x32xf32, #tpu.memory_space<vmem>>, vector<16x32xf32>
      tpu.vector_store %arg9[%c0_31, %c0_32], %48 {strides = array<i32>} : memref<16x32xf32, #tpu.memory_space<vmem>>, vector<16x32xf32>,
    } else {
    }
    %c0_22 = arith.constant 0 : index
    %c0_23 = arith.constant 0 : index
    %37 = vector.load %arg9[%c0_22, %c0_23] : memref<16x32xf32, #tpu.memory_space<vmem>>, vector<16x32xf32>
    %38 = vector.broadcast %33 : vector<16x1xf32> to vector<16x32xf32>
    %39 = arith.mulf %38, %25 : vector<16x32xf32>
    %40 = arith.addf %37, %39 : vector<16x32xf32>
    %c0_24 = arith.constant 0 : index
    %c0_25 = arith.constant 0 : index
    %41 = vector.load %arg9[%c0_24, %c0_25] : memref<16x32xf32, #tpu.memory_space<vmem>>, vector<16x32xf32>
    tpu.vector_store %arg9[%c0_24, %c0_25], %40 {strides = array<i32>} : memref<16x32xf32, #tpu.memory_space<vmem>>, vector<16x32xf32>,
    return
  }
  func.func @transform_0(%arg0: i32, %arg1: i32, %arg2: i32) -> (i32, i32) {
    %c0_i32 = arith.constant 0 : i32
    %c0_i32_0 = arith.constant 0 : i32
    return %arg0, %c0_i32 : i32, i32
  }
  func.func @transform_1(%arg0: i32, %arg1: i32, %arg2: i32) -> (i32, i32) {
    %c0_i32 = arith.constant 0 : i32
    %c0_i32_0 = arith.constant 0 : i32
    return %arg0, %c0_i32 : i32, i32
  }
  func.func @transform_2(%arg0: i32, %arg1: i32, %arg2: i32) -> (i32, i32, i32) {
    %c0_i32 = arith.constant 0 : i32
    %c0_i32_0 = arith.constant 0 : i32
    return %arg1, %c0_i32, %arg2 : i32, i32, i32
  }
  func.func @transform_3(%arg0: i32, %arg1: i32, %arg2: i32) -> (i32, i32, i32) {
    %c0_i32 = arith.constant 0 : i32
    %c0_i32_0 = arith.constant 0 : i32
    return %arg1, %c0_i32, %arg2 : i32, i32, i32
  }
  func.func @transform_4(%arg0: i32, %arg1: i32, %arg2: i32) -> (i32, i32, i32) {
    %c0_i32 = arith.constant 0 : i32
    %c0_i32_0 = arith.constant 0 : i32
    return %arg1, %arg2, %c0_i32 : i32, i32, i32
  }
  func.func @transform_5(%arg0: i32, %arg1: i32, %arg2: i32) -> (i32, i32, i32) {
    %c0_i32 = arith.constant 0 : i32
    %c0_i32_0 = arith.constant 0 : i32
    %c0_i32_1 = arith.constant 0 : i32
    return %arg1, %c0_i32, %c0_i32_0 : i32, i32, i32
  }
  func.func @transform_6(%arg0: i32, %arg1: i32, %arg2: i32) -> (i32, i32) {
    %c0_i32 = arith.constant 0 : i32
    %c0_i32_0 = arith.constant 0 : i32
    return %arg0, %c0_i32 : i32, i32
  }
}

module attributes {stable_mosaic.version = 11 : i64} {
  func.func @_ln_kernel(%arg0: i32, %arg1: memref<16x32xf32, #tpu.memory_space<vmem>>, %arg2: memref<1x32xf32, #tpu.memory_space<vmem>>, %arg3: memref<1x32xf32, #tpu.memory_space<vmem>>, %arg4: memref<16x32xf32, #tpu.memory_space<vmem>>, %arg5: memref<16x32xf32, #tpu.memory_space<vmem>>) attributes {dimension_semantics = [#tpu.dimension_semantics<parallel>], iteration_bounds = array<i64: 1>, scalar_prefetch = 0 : i64, scratch_operands = 0 : i64, tpu.core_type = #tpu.core_type<tc>, window_params = [{transform_indices = @transform_0, window_bounds = array<i64: 16, 32>}, {pipeline_mode = #tpu.pipeline_mode<synchronous>, transform_indices = @transform_1, window_bounds = array<i64: 1, 32>}, {pipeline_mode = #tpu.pipeline_mode<synchronous>, transform_indices = @transform_2, window_bounds = array<i64: 1, 32>}, {transform_indices = @transform_3, window_bounds = array<i64: 16, 32>}, {transform_indices = @transform_4, window_bounds = array<i64: 16, 32>}]} {
    %c0 = arith.constant 0 : index
    %c0_0 = arith.constant 0 : index
    %0 = vector.load %arg1[%c0, %c0_0] : memref<16x32xf32, #tpu.memory_space<vmem>>, vector<16x32xf32>
    %cst = arith.constant dense<0.000000e+00> : vector<16xf32>
    %1 = vector.multi_reduction <add>, %0, %cst [1] : vector<16x32xf32> to vector<16xf32>
    %2 = vector.shape_cast %1 : vector<16xf32> to vector<16x1xf32>
    %cst_1 = arith.constant 3.200000e+01 : f32
    %3 = vector.broadcast %cst_1 : f32 to vector<16x1xf32>
    %4 = arith.divf %2, %3 : vector<16x1xf32>
    %5 = vector.broadcast %4 : vector<16x1xf32> to vector<16x32xf32>
    %6 = arith.subf %0, %5 : vector<16x32xf32>
    %7 = arith.mulf %6, %6 : vector<16x32xf32>
    %cst_2 = arith.constant dense<0.000000e+00> : vector<16xf32>
    %8 = vector.multi_reduction <add>, %7, %cst_2 [1] : vector<16x32xf32> to vector<16xf32>
    %9 = vector.shape_cast %8 : vector<16xf32> to vector<16x1xf32>
    %cst_3 = arith.constant 3.200000e+01 : f32
    %10 = vector.broadcast %cst_3 : f32 to vector<16x1xf32>
    %11 = arith.divf %9, %10 : vector<16x1xf32>
    %12 = vector.broadcast %4 : vector<16x1xf32> to vector<16x32xf32>
    %13 = arith.subf %0, %12 : vector<16x32xf32>
    %cst_4 = arith.constant 9.99999974E-6 : f32
    %14 = vector.broadcast %cst_4 : f32 to vector<16x1xf32>
    %15 = arith.addf %11, %14 : vector<16x1xf32>
    %16 = math.rsqrt %15 : vector<16x1xf32>
    %17 = vector.broadcast %16 : vector<16x1xf32> to vector<16x32xf32>
    %18 = arith.mulf %13, %17 : vector<16x32xf32>
    %c0_5 = arith.constant 0 : index
    %c0_6 = arith.constant 0 : index
    %19 = vector.load %arg2[%c0_5, %c0_6] : memref<1x32xf32, #tpu.memory_space<vmem>>, vector<1x32xf32>
    %20 = vector.broadcast %19 : vector<1x32xf32> to vector<16x32xf32>
    %21 = arith.mulf %18, %20 : vector<16x32xf32>
    %c0_7 = arith.constant 0 : index
    %c0_8 = arith.constant 0 : index
    %22 = vector.load %arg3[%c0_7, %c0_8] : memref<1x32xf32, #tpu.memory_space<vmem>>, vector<1x32xf32>
    %23 = vector.broadcast %22 : vector<1x32xf32> to vector<16x32xf32>
    %24 = arith.addf %21, %23 : vector<16x32xf32>
    %c0_9 = arith.constant 0 : index
    %c0_10 = arith.constant 0 : index
    %25 = vector.load %arg4[%c0_9, %c0_10] : memref<16x32xf32, #tpu.memory_space<vmem>>, vector<16x32xf32>
    %26 = arith.addf %24, %25 : vector<16x32xf32>
    %c0_11 = arith.constant 0 : index
    %c0_12 = arith.constant 0 : index
    %27 = vector.load %arg5[%c0_11, %c0_12] : memref<16x32xf32, #tpu.memory_space<vmem>>, vector<16x32xf32>
    tpu.vector_store %arg5[%c0_11, %c0_12], %26 {strides = array<i32>} : memref<16x32xf32, #tpu.memory_space<vmem>>, vector<16x32xf32>,
    return
  }
  func.func @transform_0(%arg0: i32) -> (i32, i32) {
    %c0_i32 = arith.constant 0 : i32
    %c0_i32_0 = arith.constant 0 : i32
    return %arg0, %c0_i32 : i32, i32
  }
  func.func @transform_1(%arg0: i32) -> (i32, i32) {
    %c0_i32 = arith.constant 0 : i32
    %c0_i32_0 = arith.constant 0 : i32
    %c0_i32_1 = arith.constant 0 : i32
    return %c0_i32, %c0_i32_0 : i32, i32
  }
  func.func @transform_2(%arg0: i32) -> (i32, i32) {
    %c0_i32 = arith.constant 0 : i32
    %c0_i32_0 = arith.constant 0 : i32
    %c0_i32_1 = arith.constant 0 : i32
    return %c0_i32, %c0_i32_0 : i32, i32
  }
  func.func @transform_3(%arg0: i32) -> (i32, i32) {
    %c0_i32 = arith.constant 0 : i32
    %c0_i32_0 = arith.constant 0 : i32
    return %arg0, %c0_i32 : i32, i32
  }
  func.func @transform_4(%arg0: i32) -> (i32, i32) {
    %c0_i32 = arith.constant 0 : i32
    %c0_i32_0 = arith.constant 0 : i32
    return %arg0, %c0_i32 : i32, i32
  }
}

</mosaic_0001>

<bundles_post_ra>
// kernel: deepseek_forward.20
= control target key start
LH: loop header
LB: loop body
LE: loop exit
PB: predicated region body
PF: predicated region fallthrough
CT: control target
= control target key end

     0   :  { %vm20_vm0 = vcmask 261120   ;;  %v170_v15 = vmov 0.0   ;;  %vm171_vm1 = vmmov 0   ;;  %vm135_vm2 = vcmask 191488   ;;  %s226_s0 = inlined_call_operand.vmem [shape: f32[16,32], index: 0, kind: input, shape index: {}]   ;;  %s227_s1 = inlined_call_operand.vmem [shape: bf16[32,24], index: 1, kind: input, shape index: {}]   ;;  %s228_s2 = inlined_call_operand.vmem [shape: f32[1,32], index: 2, kind: input, shape index: {}]   ;;  %s229_s3 = inlined_call_operand.vmem [shape: f32[1,32], index: 3, kind: input, shape index: {}]   ;;  %s230_s4 = inlined_call_operand.vmem [shape: bf16[16,24], index: 4, kind: output, shape index: {}]  }
   0x1   :  { %v18_v0 = vld [vmem:[%s226_s0] sm:$0xff]  ;;  %v19_v1 = vld [vmem:[%s226_s0 + $0x8] sm:$0xff]  ;;  %154 = vmatprep.subr.bf16.mxu0 %v170_v15  ;;  %158 = vmatprep.mubr.msk.bf16.mxu0 %vm171_vm1, %v170_v15 }
   0x2   :  { %v21_v2 = vsel %vm20_vm0, %v18_v0, 0.0  ;;  %v24_v3 = vsel %vm20_vm0, %v19_v1, 0.0  ;;  %v164_v14 = vld [vmem:[%s227_s1] sm:$0xff]   ;;  %v165_v16 = vld [vmem:[%s227_s1 + $0x8] sm:$0xff]  }
   0x3   :  { %22 = vadd.xlane.f32.xlu0 %v21_v2  ;;  %155 = vmatpush3.bf16.msra.mxu0 %v164_v14  ;;  %v142_v25 = vld [vmem:[%s228_s2] ss:$0 sm:$0xff] }
   0x4   :  { %156 = vmatprep.subr.bf16.mxu0 %v170_v15  ;;  %v143_v29 = vld [vmem:[%s229_s3] ss:$0 sm:$0xff] }
   0x7   :  { %25 = vadd.xlane.f32.xlu0 %v24_v3  ;;  %157 = vmatpush3.bf16.msra.mxu0 %v165_v16 }
  0x90   :  { %v23_v4 = vpop.xlane.xlu0 %22 }
  0x91   :  { %v28_v5 = vmul.f32 0.03125, %v23_v4 }
  0x93   :  { %v30_v6 = vsub.f32 %v18_v0, %v28_v5 }
  0x94   :  { %v26_v7 = vpop.xlane.xlu0 %25 }
  0x95   :  { %v29_v8 = vmul.f32 0.03125, %v26_v7  ;;  %v32_v9 = vmul.f32 %v30_v6, %v30_v6 }
  0x97   :  { %v31_v10 = vsub.f32 %v19_v1, %v29_v8  ;;  %v34_v11 = vsel %vm20_vm0, %v32_v9, 0.0 }
  0x98   :  { %35 = vadd.xlane.f32.xlu1 %v34_v11 }
  0x99   :  { %v33_v12 = vmul.f32 %v31_v10, %v31_v10 }
  0x9b   :  { %v37_v13 = vsel %vm20_vm0, %v33_v12, 0.0 }
  0x9c   :  { %38 = vadd.xlane.f32.xlu1 %v37_v13 }
 0x125   :  { %v36_v17 = vpop.xlane.xlu1 %35 }
 0x126   :  { %v40_v18 = vmul.f32 0.03125, %v36_v17 }
 0x128   :  { %v42_v19 = vadd.f32 1e-05, %v40_v18 }
 0x129   :  { %v39_v20 = vpop.xlane.xlu1 %38 }
 0x12a   :  { %166 = vrsqrt.f32 %v42_v19  ;;  %v41_v21 = vmul.f32 0.03125, %v39_v20 }
 0x12c   :  { %v43_v22 = vadd.f32 1e-05, %v41_v21 }
 0x12e   :  { %168 = vrsqrt.f32 %v43_v22 }
 0x134   :  { %v167_v23 = vpop.eup %166 }
 0x135   :  { %v46_v24 = vmul.f32 %v167_v23, %v30_v6 }
 0x137   :  { %v55_v28 = vmul.f32 %v142_v25, %v46_v24 }
 0x138   :  { %v169_v26 = vpop.eup %168 }
 0x139   :  { %v47_v27 = vmul.f32 %v169_v26, %v31_v10  ;;  %v64_v31 = vadd.f32 %v143_v29, %v55_v28 }
 0x13b   :  { %v56_v30 = vmul.f32 %v142_v25, %v47_v27 }
 0x13d   :  { %v65_v32 = vadd.f32 %v143_v29, %v56_v30 }
 0x13f   :  { %v66_v33 = vpack.c.bf16 %v65_v32, %v64_v31 }
 0x141   :  { %159 = vmatmul.mubr.msk.bf16.vlgmr.msra.gmra.mrb[0].mxu0 %vm20_vm0, %v66_v33 }
 0x214   :  { %v120_v34 = vpop.f32.mrb[0].mxu0 }
 0x215   :  { %v149_v35 = vpack.c.bf16 %v120_v34, %v120_v34  ;;  %v160_v36 = vpop.f32.mrb[1].mxu0 }
 0x216   :  { %v123_v37 = vpop.f32.mrb[2].mxu0 }
 0x217   :  { %136 = vst.msk [vmem:[%s230_s4] sm:$0xf] %vm135_vm2, %v149_v35  ;;  %v150_v38 = vpack.c.bf16 %v123_v37, %v123_v37  ;;  %v161_v39 = vpop.f32.mrb[3].mxu0 }
 0x219   :  { %137 = vst.msk [vmem:[%s230_s4 + $0x4] sm:$0xf] %vm135_vm2, %v150_v38 }

// kernel: deepseek_forward.21
= control target key start
LH: loop header
LB: loop body
LE: loop exit
PB: predicated region body
PF: predicated region fallthrough
CT: control target
= control target key end

     0   :  { %v106_v0 = vmov 0.0   ;;  %vm107_vm0 = vmmov 0   ;;  %vm27_vm1 = vcmask 130048   ;;  %vm80_vm2 = vcmask 257024   ;;  %s135_s1 = inlined_call_operand.vmem [shape: bf16[16,32], index: 1, kind: input, shape index: {}]   ;;  %s136_s0 = inlined_call_operand.vmem [shape: bf16[16,16], index: 0, kind: input, shape index: {}]   ;;  %s137_s2 = inlined_call_operand.vmem [shape: bf16[16,32], index: 2, kind: output, shape index: {}]  }
   0x1   :  { %96 = vmatprep.subr.bf16.mxu0 %v106_v0  ;;  %v104_v1 = vld [vmem:[%s135_s1] sm:$0xff]   ;;  %98 = vmatprep.mubr.msk.bf16.mxu0 %vm107_vm0, %v106_v0 }
   0x2   :  { %v105_v2 = vld [vmem:[%s136_s0] sm:$0xff]   ;;  %97 = vmatpush3.bf16.msra.mxu0 %v104_v1 }
   0x5   :  { %99 = vmatmul.mubr.msk.bf16.vlgmr.msra.gmra.mrb[0].mxu0 %vm27_vm1, %v105_v2 }
  0xd8   :  { %v65_v3 = vpop.f32.mrb[0].mxu0 }
  0xd9   :  { %v92_v4 = vpack.c.bf16 %v65_v3, %v65_v3  ;;  %v100_v5 = vpop.f32.mrb[1].mxu0 }
  0xda   :  { %v68_v6 = vpop.f32.mrb[2].mxu0 }
  0xdb   :  { %81 = vst.msk [vmem:[%s137_s2] sm:$0xf] %vm80_vm2, %v92_v4  ;;  %v93_v7 = vpack.c.bf16 %v68_v6, %v68_v6  ;;  %v101_v8 = vpop.f32.mrb[3].mxu0 }
  0xdd   :  { %82 = vst.msk [vmem:[%s137_s2 + $0x4] sm:$0xf] %vm80_vm2, %v93_v7 }

// kernel: deepseek_forward.22
= control target key start
LH: loop header
LB: loop body
LE: loop exit
PB: predicated region body
PF: predicated region fallthrough
CT: control target
= control target key end

     0   :  { %vm24_vm0 = vcmask 1043456   ;;  %v101_v0 = vmov 0.0   ;;  %vm102_vm1 = vmmov 0   ;;  %vm20_vm2 = vcmask 64512   ;;  %s130_s1 = inlined_call_operand.vmem [shape: bf16[8,32], index: 1, kind: input, shape index: {}]   ;;  %s131_s0 = inlined_call_operand.vmem [shape: bf16[16,8], index: 0, kind: input, shape index: {}]   ;;  %s132_s2 = inlined_call_operand.vmem [shape: bf16[16,32], index: 2, kind: output, shape index: {}]  }
   0x1   :  { %92 = vmatprep.subr.bf16.mxu0 %v101_v0  ;;  %v14_v1 = vld [vmem:[%s130_s1] sm:$0xf]  ;;  %94 = vmatprep.mubr.msk.bf16.mxu0 %vm102_vm1, %v101_v0  ;;  %vm77_vm3 = vcmask 257024  }
   0x2   :  { %v26_v2 = vsel %vm24_vm0, %v14_v1, 0  ;;  %v100_v3 = vld [vmem:[%s131_s0] sm:$0xff]  }
   0x3   :  { %93 = vmatpush3.bf16.msra.mxu0 %v26_v2 }
   0x6   :  { %95 = vmatmul.mubr.msk.bf16.vlgmr.msra.gmra.mrb[0].mxu0 %vm20_vm2, %v100_v3 }
  0xd9   :  { %v62_v4 = vpop.f32.mrb[0].mxu0 }
  0xda   :  { %v88_v5 = vpack.c.bf16 %v62_v4, %v62_v4  ;;  %v96_v6 = vpop.f32.mrb[1].mxu0 }
  0xdb   :  { %v65_v7 = vpop.f32.mrb[2].mxu0 }
  0xdc   :  { %78 = vst.msk [vmem:[%s132_s2] sm:$0xf] %vm77_vm3, %v88_v5  ;;  %v89_v8 = vpack.c.bf16 %v65_v7, %v65_v7  ;;  %v97_v9 = vpop.f32.mrb[3].mxu0 }
  0xde   :  { %79 = vst.msk [vmem:[%s132_s2 + $0x4] sm:$0xf] %vm77_vm3, %v89_v8 }

// kernel: deepseek_forward.23
= control target key start
LH: loop header
LB: loop body
LE: loop exit
PB: predicated region body
PF: predicated region fallthrough
CT: control target
= control target key end

     0   :  { %s1151_s18 = smov 0   ;;  %s1345_s0 = inlined_call_operand.vmem [shape: bf16[2,8,32], index: 0, kind: input, shape index: {}]   ;;  %s1346_s1 = inlined_call_operand.vmem [shape: bf16[2,8,16], index: 1, kind: input, shape index: {}]   ;;  %s1347_s2 = inlined_call_operand.vmem [shape: bf16[2,8,16], index: 2, kind: input, shape index: {}]   ;;  %s1348_s3 = inlined_call_operand.vmem [shape: f32[8,4], index: 3, kind: input, shape index: {}]   ;;  %s1349_s4 = inlined_call_operand.vmem [shape: f32[8,4], index: 4, kind: input, shape index: {}]   ;;  %s1350_s5 = inlined_call_operand.vmem [shape: bf16[2,8,32], index: 5, kind: output, shape index: {}]  }
   0x1 LB: > { %s964_s19 = sadd.s32 4294967295, %s1104_s18   ;;  %p968_p0 = scmp.ge.s32.totalorder %s1104_s18, 1  ;;  %s1104_s18 = sphi %s1151_s18, %s15_s18  }
   0x2   : > { %p204_p1 = scmp.lt.s32.totalorder %s1104_s18, 3 }
   0x4   : > { %p205_p2 = pnand %p968_p0, %p204_p1 }
   0x5   : > { %v1162_v0 = vld [vmem:[%s1348_s3] sm:$0xff] (!%p205_p2)  ;;  %s1106_s22 = smov (!%p205_p2), 4   ;;  %p238_p3 = scmp.lt.s32.totalorder (!%p205_p2), %s964_s19, 1  ;;  %v1108_v12 = vmov (!%p205_p2), 0.0   ;;  %vm1109_vm0 = vmmov (!%p205_p2), 0   ;;  %vm292_vm1 = vcmask (!%p205_p2), 31744   ;;  %v260_v42 = vlaneseq (!%p205_p2) }
   0x6   : > { %208 = sbr.rel (%p205_p2) target bundleno = 1783 (0x6f7), region = 40  ;;  %279 = vrot.lane.b32.xlu0 (!%p205_p2), %v1162_v0, %s1106_s22  ;;  %v1169_v1 = vld [vmem:[%s1349_s4] sm:$0xff] (!%p205_p2)  ;;  %s1107_s7 = smov (!%p205_p2), 124   ;;  %1000 = vmatprep.subr.bf16.mxu0 (!%p205_p2), %v1108_v12  ;;  %vm316_vm2 = vcmask (!%p205_p2), 64512   ;;  %vm380_vm4 = vcmask (!%p205_p2), 1043456   ;;  %vm880_vm5 = vcmask (!%p205_p2), 130048  }
   0x7   : > { %1006 = vmatprep.subr.bf16.mxu1 (!%p205_p2), %v1108_v12  ;;  %1002 = vmatprep.mubr.msk.bf16.mxu0 (!%p205_p2), %vm1109_vm0, %v1108_v12  ;;  %s1110_s8 = smov (!%p205_p2), 12   ;;  %s1111_s9 = smov (!%p205_p2), 20   ;;  %v1247_v43 = vshrl.u32 (!%p205_p2), %v260_v42, 7  ;;  %v1249_v44 = vand.u32 (!%p205_p2), 127, %v260_v42  ;;  %vm882_vm6 = vcmask (!%p205_p2), 195584   ;;  %vm885_vm7 = vcmask (!%p205_p2), 257024  }
   0x8   : > { %1008 = vmatprep.mubr.msk.bf16.mxu1 (!%p205_p2), %vm1109_vm0, %v1108_v12  ;;  %s1112_s10 = smov (!%p205_p2), 28   ;;  %s1113_s11 = smov (!%p205_p2), 8  }
   0x9   : > { %s1114_s12 = smov (!%p205_p2), 16   ;;  %s1115_s13 = smov (!%p205_p2), 24   ;;  %vm264_vm3 = vcmp.gt.s32.totalorder (!%p205_p2), %v1249_v44, %v1247_v43 }
   0xa   : > { %268 = vrot.lane.b32.xlu0 (!%p205_p2), %v1169_v1, %s1106_s22  ;;  %s1116_s14 = smov (!%p205_p2), 120   ;;  %s1117_s15 = smov (!%p205_p2), 112  }
   0xb   : > { %s1118_s16 = smov (!%p205_p2), 116   ;;  %s1119_s17 = smov (!%p205_p2), 104  }
   0xd   : > { %s1352_s19 = smov (!%p238_p3, %s964_s19), 1 }
   0xe   : > { %s1173_s25 = sshll.u32 %s1352_s19, 2  ;;  %s1120_s19 = smov 108  }
   0xf   : > { %s245_s28 = scalar_lea.vmem %s1346_s1, %s1173_s25  ;;  %s241_s6 = scalar_lea.vmem %s1345_s0, %s1173_s25 }
  0x10   : > { %v256_v2 = vld [vmem:[%s245_s28] sm:$0xf]  ;;  %s253_s26 = scalar_lea.vmem %s1350_s5, %s1173_s25 }
  0x11   : > { %v1183_v3 = vunpack.c.l.bf16 %v256_v2  ;;  %v255_v4 = vld [vmem:[%s241_s6] sm:$0xf] }
  0x12   : > { %v1185_v6 = vunpack.c.l.bf16 %v255_v4 }
  0x13   : > { %v277_v13 = vmul.f32 %v1183_v3, %v1169_v1  ;;  %v266_v19 = vmul.f32 %v1183_v3, %v1162_v0 }
  0x14   : > { %v303_v16 = vmul.f32 %v1185_v6, %v1169_v1  ;;  %v296_v23 = vmul.f32 %v1185_v6, %v1162_v0 }
  0x78   : > { %v280_v5 = vpop.permute.xlu0 %279 }
  0x79   : > { %v282_v7 = vmul.f32 %v280_v5, %v1183_v3  ;;  %v304_v9 = vmul.f32 %v1185_v6, %v280_v5 }
  0x7b   : > { %284 = vrot.lane.b32.xlu1 %v282_v7, %s1107_s7 }
  0x7c   : > { %v269_v8 = vpop.permute.xlu0 %268 }
  0x7d   : > { %v271_v10 = vmul.f32 %v269_v8, %v1183_v3  ;;  %v297_v11 = vmul.f32 %v1185_v6, %v269_v8 }
  0x7f   : > { %306 = vrot.lane.b32.xlu1 %v304_v9, %s1107_s7  ;;  %273 = vrot.lane.b32.xlu0 %v271_v10, %s1107_s7 }
  0x83   : > { %299 = vrot.lane.b32.xlu0 %v297_v11, %s1107_s7 }
  0xed   : > { %v285_v14 = vpop.permute.xlu1 %284 }
  0xee   : > { %v287_v15 = vadd.f32 %v285_v14, %v277_v13 }
  0xf0   : > { %289 = vrot.lane.b32.xlu1 %v287_v15, %s1106_s22 }
  0xf1   : > { %v307_v17 = vpop.permute.xlu1 %306  ;;  %v274_v20 = vpop.permute.xlu0 %273 }
  0xf2   : > { %v309_v18 = vadd.f32 %v307_v17, %v303_v16  ;;  %v276_v21 = vsub.f32 %v266_v19, %v274_v20 }
  0xf4   : > { %311 = vrot.lane.b32.xlu1 %v309_v18, %s1106_s22  ;;  %s249_s22 = scalar_lea.vmem %s1347_s2, %s1173_s25 }
  0xf5   : > { %v300_v25 = vpop.permute.xlu0 %299 }
  0xf6   : > { %v302_v29 = vsub.f32 %v296_v23, %v300_v25 }
  0xf8   : > { %428 = vrot.lane.b32.xlu1 %v1169_v1, %s1110_s8 }
  0xfc   : > { %441 = vrot.lane.b32.xlu1 %v1162_v0, %s1110_s8 }
 0x100   : > { %588 = vrot.lane.b32.xlu1 %v1169_v1, %s1111_s9 }
 0x104   : > { %601 = vrot.lane.b32.xlu1 %v1162_v0, %s1111_s9 }
 0x108   : > { %735 = vrot.lane.b32.xlu1 %v1169_v1, %s1112_s10 }
 0x10c   : > { %748 = vrot.lane.b32.xlu1 %v1162_v0, %s1112_s10 }
 0x110   : > { %424 = vrot.lane.b32.xlu1 %v1162_v0, %s1113_s11 }
 0x114   : > { %437 = vrot.lane.b32.xlu1 %v1169_v1, %s1113_s11 }
 0x162   : > { %v290_v22 = vpop.permute.xlu1 %289 }
 0x163   : > { %v293_v24 = vsel %vm292_vm1, %v276_v21, %v290_v22 }
 0x164   : > { %v294_v26 = vpack.c.bf16 %v293_v24, %v293_v24 }
 0x166   : > { %v312_v27 = vpop.permute.xlu1 %311  ;;  %v1219_v28 = vsel %vm316_vm2, %v294_v26, 0 }
 0x167   : > { %1001 = vmatpush3.bf16.xpose.msra.mxu0 %v1219_v28  ;;  %v314_v30 = vsel %vm292_vm1, %v302_v29, %v312_v27 }
 0x168   : > { %1018 = vmatprep.subr.bf16.mxu0 %v1108_v12  ;;  %v315_v31 = vpack.c.bf16 %v314_v30, %v314_v30 }
 0x16a   : > { %v429_v32 = vpop.permute.xlu1 %428 }
 0x16b   : > { %v561_v35 = vmul.f32 %v429_v32, %v1183_v3  ;;  %v431_v52 = vmul.f32 %v429_v32, %v1185_v6  ;;  %v1280_v32 = vld [vmem:[%s249_s22] sm:$0xf] }
 0x16e   : > { %1003 = vmatmul.mubr.msk.bf16.vlgmr.msra.gmra.mrb[0].mxu0 %vm316_vm2, %v315_v31  ;;  %v442_v33 = vpop.permute.xlu1 %441 }
 0x16f   : > { %1020 = vmatprep.mubr.msk.bf16.mxu0 %vm1109_vm0, %v1108_v12  ;;  %v444_v34 = vmul.f32 %v442_v33, %v1185_v6  ;;  %v568_v36 = vmul.f32 %v442_v33, %v1183_v3  ;;  %v382_v33 = vsel %vm380_vm4, %v1280_v32, 0 }
 0x170   : > { %1007 = vmatpush3.bf16.msra.mxu1 %v382_v33  ;;  %1019 = vmatpush3.bf16.msra.mxu0 %v382_v33 }
 0x171   : > { %446 = vrot.lane.b32.xlu1 %v444_v34, %s1107_s7  ;;  %1012 = vmatprep.subr.bf16.mxu1 %v1108_v12 }
 0x172   : > { %v589_v37 = vpop.permute.xlu1 %588  ;;  %1030 = vmatprep.subr.bf16.mxu0 %v1108_v12 }
 0x173   : > { %v591_v38 = vmul.f32 %v589_v37, %v1185_v6 }
 0x175   : > { %563 = vrot.lane.b32.xlu1 %v561_v35, %s1107_s7 }
 0x176   : > { %v602_v39 = vpop.permute.xlu1 %601 }
 0x177   : > { %v604_v53 = vmul.f32 %v602_v39, %v1185_v6 }
 0x179   : > { %570 = vrot.lane.b32.xlu1 %v568_v36, %s1107_s7 }
 0x17a   : > { %v736_v40 = vpop.permute.xlu1 %735 }
 0x17b   : > { %v738_v41 = vmul.f32 %v736_v40, %v1185_v6 }
 0x17d   : > { %584 = vrot.lane.b32.xlu1 %v1162_v0, %s1114_s12 }
 0x17e   : > { %v749_v54 = vpop.permute.xlu1 %748 }
 0x17f   : > { %v751_v55 = vmul.f32 %v749_v54, %v1185_v6 }
 0x181   : > { %597 = vrot.lane.b32.xlu1 %v1169_v1, %s1114_s12 }
 0x182   : > { %v425_v56 = vpop.permute.xlu1 %424 }
 0x183   : > { %v560_v62 = vmul.f32 %v425_v56, %v1183_v3  ;;  %v427_v2 = vmul.f32 %v425_v56, %v1185_v6 }
 0x185   : > { %593 = vrot.lane.b32.xlu1 %v591_v38, %s1107_s7 }
 0x186   : > { %v438_v57 = vpop.permute.xlu1 %437 }
 0x187   : > { %v440_v4 = vmul.f32 %v438_v57, %v1185_v6 }
 0x189   : > { %731 = vrot.lane.b32.xlu1 %v1162_v0, %s1115_s13 }
 0x18d   : > { %740 = vrot.lane.b32.xlu1 %v738_v41, %s1107_s7 }
 0x1e3   : > { %v447_v58 = vpop.permute.xlu1 %446 }
 0x1e4   : > { %v449_v10 = vadd.f32 %v447_v58, %v440_v4 }
 0x1e7   : > { %v564_v59 = vpop.permute.xlu1 %563 }
 0x1e8   : > { %v566_v8 = vsub.f32 %v560_v62, %v564_v59 }
 0x1eb   : > { %v571_v60 = vpop.permute.xlu1 %570 }
 0x1ef   : > { %v585_v61 = vpop.permute.xlu1 %584 }
 0x1f0   : > { %v587_v17 = vmul.f32 %v585_v61, %v1185_v6 }
 0x1f3   : > { %v598_v5 = vpop.permute.xlu1 %597 }
 0x1f7   : > { %v594_v15 = vpop.permute.xlu1 %593 }
 0x1f8   : > { %v596_v20 = vsub.f32 %v587_v17, %v594_v15 }
 0x1fb   : > { %v732_v19 = vpop.permute.xlu1 %731 }
 0x1fc   : > { %v734_v25 = vmul.f32 %v732_v19, %v1185_v6 }
 0x1ff   : > { %v741_v26 = vpop.permute.xlu1 %740 }
 0x200   : > { %v743_v27 = vsub.f32 %v734_v25, %v741_v26 }
 0x241   : > { %v357_v45 = vpop.f32.mrb[0].mxu0 }
 0x242   : > { %v363_v46 = vmul.f32 0.35355338, %v357_v45  ;;  %v1004_v47 = vpop.f32.mrb[1].mxu0 }
 0x243   : > { %v360_v48 = vpop.f32.mrb[2].mxu0 }
 0x244   : > { %v1005_v49 = vpop.f32.mrb[3].mxu0  ;;  %v364_v50 = vsel %vm264_vm3, -1e+30, %v363_v46 }
 0x245   : > { %v365_v51 = vsel %vm316_vm2, %v364_v50, -inf }
 0x246   : > { %366 = vmax.xlane.f32.xlu0 %v365_v51 }
 0x25c   : > { %433 = vrot.lane.b32.xlu0 %v431_v52, %s1107_s7 }
 0x260   : > { %606 = vrot.lane.b32.xlu0 %v604_v53, %s1107_s7 }
 0x264   : > { %744 = vrot.lane.b32.xlu0 %v1169_v1, %s1115_s13  ;;  %v567_v1 = vmul.f32 %v438_v57, %v1183_v3  ;;  %v600_v3 = vmul.f32 %v598_v5, %v1185_v6 }
 0x266   : > { %v573_v13 = vadd.f32 %v571_v60, %v567_v1 }
 0x268   : > { %753 = vrot.lane.b32.xlu0 %v751_v55, %s1107_s7  ;;  %v1076_v16 = vpack.i.bf16 %v573_v13, %v449_v10 }
 0x2d3   : > { %v367_v63 = vpop.xlane.xlu0 %366 }
 0x2d4   : > { %v368_v0 = vsub.f32 %v364_v50, %v367_v63 }
 0x2d6   : > { %v369_v7 = vmul.f32 1.442695, %v368_v0 }
 0x2d7   : > { %v434_v9 = vpop.permute.xlu0 %433 }
 0x2d8   : > { %1082 = vpow2.f32 %v369_v7  ;;  %v436_v11 = vsub.f32 %v427_v2, %v434_v9 }
 0x2da   : > { %v1071_v14 = vpack.i.bf16 %v566_v8, %v436_v11 }
 0x2db   : > { %v607_v18 = vpop.permute.xlu0 %606 }
 0x2dc   : > { %1072 = vrot.lane.b32.xlu0 %v1071_v14, %s1116_s14  ;;  %v609_v24 = vadd.f32 %v607_v18, %v600_v3 }
 0x2df   : > { %v745_v23 = vpop.permute.xlu0 %744 }
 0x2e0   : > { %1077 = vrot.lane.b32.xlu0 %v1076_v16, %s1107_s7  ;;  %v747_v29 = vmul.f32 %v745_v23, %v1185_v6 }
 0x2e2   : > { %v1083_v21 = vpop.eup %1082 }
 0x2e3   : > { %v371_v22 = vsel %vm316_vm2, %v1083_v21, 0.0  ;;  %v754_v30 = vpop.permute.xlu0 %753 }
 0x2e4   : > { %372 = vadd.xlane.f32.xlu1 %v371_v22  ;;  %611 = vrot.lane.b32.xlu0 %v596_v20, %s1117_s15  ;;  %v756_v31 = vadd.f32 %v754_v30, %v747_v29  ;;  %v978_v20 = vcombine.low %v1280_v32, %v1280_v32 }
 0x2e8   : > { %615 = vrot.lane.b32.xlu0 %v609_v24, %s1118_s16 }
 0x2ec   : > { %758 = vrot.lane.b32.xlu0 %v743_v27, %s1119_s17 }
 0x2f0   : > { %762 = vrot.lane.b32.xlu0 %v756_v31, %s1120_s19 }
 0x34e   : > { %v1073_v34 = vpop.permute.xlu0 %1072 }
 0x34f   : > { %v1075_v38 = vunpack.i.h.bf16 %v1073_v34  ;;  %v1074_v41 = vunpack.i.l.bf16 %v1073_v34 }
 0x352   : > { %v1078_v35 = vpop.permute.xlu0 %1077 }
 0x353   : > { %v1080_v39 = vunpack.i.h.bf16 %v1078_v35  ;;  %v1079_v42 = vunpack.i.l.bf16 %v1078_v35 }
 0x355   : > { %v582_v46 = vsel %vm292_vm1, %v1075_v38, %v1080_v39  ;;  %v458_v47 = vsel %vm292_vm1, %v1074_v41, %v1079_v42 }
 0x356   : > { %v612_v45 = vpop.permute.xlu0 %611  ;;  %v583_v48 = vpack.c.bf16 %v582_v46, %v582_v46  ;;  %v459_v49 = vpack.c.bf16 %v458_v47, %v458_v47 }
 0x358   : > { %v624_v51 = vsel %vm316_vm2, %v583_v48, 0 }
 0x35a   : > { %v616_v50 = vpop.permute.xlu0 %615 }
 0x35b   : > { %v618_v52 = vsel %vm292_vm1, %v612_v45, %v616_v50 }
 0x35c   : > { %v619_v53 = vpack.c.bf16 %v618_v52, %v618_v52 }
 0x371   : > { %v373_v6 = vpop.xlane.xlu1 %372 }
 0x372   : > { %1084 = vrcp.f32 %v373_v6 }
 0x37c   : > { %v1085_v36 = vpop.eup %1084 }
 0x37d   : > { %v375_v37 = vmul.f32 %v1085_v36, %v1083_v21 }
 0x37f   : > { %v376_v40 = vpack.c.bf16 %v375_v37, %v375_v37 }
 0x381   : > { %1009 = vmatmul.mubr.msk.bf16.vlgmr.msra.gmra.mrb[0].mxu1 %vm316_vm2, %v376_v40 }
 0x382   : > { %1013 = vmatpush3.bf16.xpose.msra.mxu1 %v1219_v28  ;;  %1014 = vmatprep.mubr.msk.bf16.mxu1 %vm1109_vm0, %v1108_v12  ;;  %v759_v28 = vpop.permute.xlu0 %758 }
 0x383   : > { %1024 = vmatprep.subr.bf16.mxu1 %v1108_v12 }
 0x386   : > { %v763_v54 = vpop.permute.xlu0 %762 }
 0x387   : > { %v765_v55 = vsel %vm292_vm1, %v759_v28, %v763_v54 }
 0x388   : > { %v766_v56 = vpack.c.bf16 %v765_v55, %v765_v55 }
 0x389   : > { %1015 = vmatmul.mubr.msk.bf16.vlgmr.msra.gmra.mrb[4].mxu1 %vm316_vm2, %v459_v49 }
 0x38a   : > { %1025 = vmatpush3.bf16.xpose.msra.mxu1 %v624_v51  ;;  %1026 = vmatprep.mubr.msk.bf16.mxu1 %vm1109_vm0, %v1108_v12 }
 0x38b   : > { %1036 = vmatprep.subr.bf16.mxu1 %v1108_v12 }
 0x391   : > { %1027 = vmatmul.mubr.msk.bf16.vlgmr.msra.gmra.mrb[8].mxu1 %vm316_vm2, %v619_v53 }
 0x392   : > { %1037 = vmatpush3.bf16.xpose.msra.mxu1 %v624_v51  ;;  %1038 = vmatprep.mubr.msk.bf16.mxu1 %vm1109_vm0, %v1108_v12 }
 0x399   : > { %1039 = vmatmul.mubr.msk.bf16.vlgmr.msra.gmra.mrb[12].mxu1 %vm316_vm2, %v766_v56 }
 0x454   : > { %v1304_v57 = vpop.f32.mrb[0].mxu1 }
 0x455   : > { %v1010_v58 = vpop.f32.mrb[1].mxu1 }
 0x456   : > { %v421_v59 = vpop.f32.mrb[2].mxu1 }
 0x457   : > { %v1011_v60 = vpop.f32.mrb[3].mxu1 }
 0x45c   : > { %v497_v61 = vpop.f32.mrb[4].mxu1 }
 0x45d   : > { %v503_v62 = vmul.f32 0.35355338, %v497_v61  ;;  %v1016_v63 = vpop.f32.mrb[5].mxu1 }
 0x45e   : > { %v500_v0 = vpop.f32.mrb[6].mxu1 }
 0x45f   : > { %v1017_v2 = vpop.f32.mrb[7].mxu1  ;;  %v504_v4 = vsel %vm264_vm3, -1e+30, %v503_v62 }
 0x460   : > { %v505_v1 = vsel %vm316_vm2, %v504_v4, -inf }
 0x461   : > { %506 = vmax.xlane.f32.xlu0 %v505_v1 }
 0x464   : > { %v660_v5 = vpop.f32.mrb[8].mxu1 }
 0x465   : > { %v666_v7 = vmul.f32 0.35355338, %v660_v5  ;;  %v1028_v8 = vpop.f32.mrb[9].mxu1 }
 0x466   : > { %v663_v9 = vpop.f32.mrb[10].mxu1 }
 0x467   : > { %v1029_v10 = vpop.f32.mrb[11].mxu1  ;;  %v667_v11 = vsel %vm264_vm3, -1e+30, %v666_v7 }
 0x468   : > { %v668_v13 = vsel %vm316_vm2, %v667_v11, -inf }
 0x469   : > { %669 = vmax.xlane.f32.xlu1 %v668_v13 }
 0x46c   : > { %v804_v14 = vpop.f32.mrb[12].mxu1 }
 0x46d   : > { %v810_v15 = vmul.f32 0.35355338, %v804_v14  ;;  %v1040_v16 = vpop.f32.mrb[13].mxu1 }
 0x46e   : > { %v807_v17 = vpop.f32.mrb[14].mxu1 }
 0x46f   : > { %v1041_v18 = vpop.f32.mrb[15].mxu1  ;;  %v811_v19 = vsel %vm264_vm3, -1e+30, %v810_v15 }
 0x470   : > { %v812_v3 = vsel %vm316_vm2, %v811_v19, -inf }
 0x471   : > { %813 = vmax.xlane.f32.xlu1 %v812_v3 }
 0x477   : > { %683 = vrot.lane.b32.xlu0 %v978_v20, %s1116_s14 }
 0x4ee   : > { %v507_v21 = vpop.xlane.xlu0 %506 }
 0x4ef   : > { %v508_v22 = vsub.f32 %v504_v4, %v507_v21 }
 0x4f1   : > { %v509_v23 = vmul.f32 1.442695, %v508_v22 }
 0x4f2   : > { %v684_v37 = vpop.permute.xlu0 %683 }
 0x4f3   : > { %1086 = vpow2.f32 %v509_v23  ;;  %v689_v39 = vsel %vm380_vm4, %v684_v37, 0 }
 0x4f6   : > { %v670_v24 = vpop.xlane.xlu1 %669 }
 0x4f7   : > { %v671_v25 = vsub.f32 %v667_v11, %v670_v24 }
 0x4f9   : > { %v672_v26 = vmul.f32 1.442695, %v671_v25 }
 0x4fb   : > { %1088 = vpow2.f32 %v672_v26 }
 0x4fd   : > { %v1087_v27 = vpop.eup %1086 }
 0x4fe   : > { %v814_v29 = vpop.xlane.xlu1 %813  ;;  %v511_v43 = vsel %vm316_vm2, %v1087_v27, 0.0 }
 0x4ff   : > { %v815_v44 = vsub.f32 %v811_v19, %v814_v29  ;;  %512 = vadd.xlane.f32.xlu1 %v511_v43 }
 0x501   : > { %v816_v30 = vmul.f32 1.442695, %v815_v44 }
 0x503   : > { %1090 = vpow2.f32 %v816_v30 }
 0x505   : > { %v1089_v31 = vpop.eup %1088 }
 0x506   : > { %v674_v32 = vsel %vm316_vm2, %v1089_v31, 0.0 }
 0x507   : > { %675 = vadd.xlane.f32.xlu1 %v674_v32 }
 0x50d   : > { %v1091_v33 = vpop.eup %1090 }
 0x50e   : > { %v818_v6 = vsel %vm316_vm2, %v1091_v33, 0.0 }
 0x50f   : > { %819 = vadd.xlane.f32.xlu1 %v818_v6 }
 0x58c   : > { %v513_v34 = vpop.xlane.xlu1 %512 }
 0x58d   : > { %1092 = vrcp.f32 %v513_v34 }
 0x594   : > { %v676_v35 = vpop.xlane.xlu1 %675 }
 0x595   : > { %1094 = vrcp.f32 %v676_v35 }
 0x597   : > { %v1093_v36 = vpop.eup %1092 }
 0x598   : > { %v515_v38 = vmul.f32 %v1093_v36, %v1087_v27 }
 0x59a   : > { %v516_v40 = vpack.c.bf16 %v515_v38, %v515_v38 }
 0x59c   : > { %1021 = vmatmul.mubr.msk.bf16.vlgmr.msra.gmra.mrb[4].mxu0 %vm316_vm2, %v516_v40  ;;  %v820_v41 = vpop.xlane.xlu1 %819 }
 0x59d   : > { %1031 = vmatpush3.bf16.msra.mxu0 %v689_v39  ;;  %1096 = vrcp.f32 %v820_v41  ;;  %1032 = vmatprep.mubr.msk.bf16.mxu0 %vm1109_vm0, %v1108_v12 }
 0x59e   : > { %1042 = vmatprep.subr.bf16.mxu0 %v1108_v12 }
 0x59f   : > { %v1095_v42 = vpop.eup %1094 }
 0x5a0   : > { %v678_v45 = vmul.f32 %v1095_v42, %v1089_v31 }
 0x5a2   : > { %v679_v46 = vpack.c.bf16 %v678_v45, %v678_v45 }
 0x5a4   : > { %1033 = vmatmul.mubr.msk.bf16.vlgmr.msra.gmra.mrb[8].mxu0 %vm316_vm2, %v679_v46 }
 0x5a5   : > { %1043 = vmatpush3.bf16.msra.mxu0 %v689_v39  ;;  %1044 = vmatprep.mubr.msk.bf16.mxu0 %vm1109_vm0, %v1108_v12 }
 0x5a7   : > { %v1097_v47 = vpop.eup %1096 }
 0x5a8   : > { %v822_v48 = vmul.f32 %v1097_v47, %v1091_v33 }
 0x5aa   : > { %v823_v49 = vpack.c.bf16 %v822_v48, %v822_v48 }
 0x5ac   : > { %1045 = vmatmul.mubr.msk.bf16.vlgmr.msra.gmra.mrb[12].mxu0 %vm316_vm2, %v823_v49 }
 0x66f   : > { %v554_v50 = vpop.f32.mrb[4].mxu0 }
 0x670   : > { %868 = vrot.lane.b32.xlu1 %v554_v50, %s1113_s11  ;;  %v1022_v51 = vpop.f32.mrb[5].mxu0 }
 0x671   : > { %v557_v28 = vpop.f32.mrb[6].mxu0 }
 0x672   : > { %v1023_v52 = vpop.f32.mrb[7].mxu0 }
 0x677   : > { %v725_v53 = vpop.f32.mrb[8].mxu0 }
 0x678   : > { %872 = vrot.lane.b32.xlu1 %v725_v53, %s1114_s12  ;;  %v1034_v54 = vpop.f32.mrb[9].mxu0 }
 0x679   : > { %v728_v55 = vpop.f32.mrb[10].mxu0 }
 0x67a   : > { %v1035_v56 = vpop.f32.mrb[11].mxu0 }
 0x67f   : > { %v861_v58 = vpop.f32.mrb[12].mxu0 }
 0x680   : > { %876 = vrot.lane.b32.xlu1 %v861_v58, %s1115_s13  ;;  %v1046_v12 = vpop.f32.mrb[13].mxu0 }
 0x681   : > { %v864_v59 = vpop.f32.mrb[14].mxu0 }
 0x682   : > { %v1047_v60 = vpop.f32.mrb[15].mxu0 }
 0x6e2   : > { %v869_v61 = vpop.permute.xlu1 %868 }
 0x6e3   : > { %v879_v63 = vsel %vm316_vm2, %v1304_v57, %v869_v61 }
 0x6ea   : > { %v873_v62 = vpop.permute.xlu1 %872 }
 0x6eb   : > { %v881_v0 = vsel %vm880_vm5, %v879_v63, %v873_v62 }
 0x6f2   : > { %v877_v2 = vpop.permute.xlu1 %876 }
 0x6f3   : > { %v883_v4 = vsel %vm882_vm6, %v881_v0, %v877_v2 }
 0x6f4   : > { %v884_v1 = vpack.c.bf16 %v883_v4, %v883_v4 }
 0x6f6   : > { %886 = vst.msk [vmem:[%s253_s26] sm:$0xf] %vm885_vm7, %v884_v1 }
 0x6f7 PF: > { %s15_s18 = sadd.s32 1, %s1104_s18  }
 0x6f8   : > { %p12_p4 = scmp.ge.s32.totalorder %s15_s18, 4  }
 0x6fa   :  { %14 = sbr.rel (!%p12_p4) target bundleno = 1 (0x1), region = 76 }

// kernel: deepseek_forward.25
= control target key start
LH: loop header
LB: loop body
LE: loop exit
PB: predicated region body
PF: predicated region fallthrough
CT: control target
= control target key end

     0   :  { %vm16_vm0 = vcmask 261120   ;;  %s118_s0 = inlined_call_operand.vmem [shape: f32[16,32], index: 0, kind: input, shape index: {}]   ;;  %s119_s1 = inlined_call_operand.vmem [shape: f32[1,32], index: 1, kind: input, shape index: {}]   ;;  %s120_s2 = inlined_call_operand.vmem [shape: f32[1,32], index: 2, kind: input, shape index: {}]   ;;  %s121_s3 = inlined_call_operand.vmem [shape: f32[16,32], index: 3, kind: output, shape index: {}]  }
   0x1   :  { %v14_v0 = vld [vmem:[%s118_s0] sm:$0xff]  ;;  %v15_v1 = vld [vmem:[%s118_s0 + $0x8] sm:$0xff] }
   0x2   :  { %v17_v2 = vsel %vm16_vm0, %v14_v0, 0.0  ;;  %v20_v3 = vsel %vm16_vm0, %v15_v1, 0.0  ;;  %v68_v21 = vld [vmem:[%s119_s1] ss:$0 sm:$0xff] }
   0x3   :  { %18 = vadd.xlane.f32.xlu0 %v17_v2  ;;  %v69_v23 = vld [vmem:[%s120_s2] ss:$0 sm:$0xff] }
   0x7   :  { %21 = vadd.xlane.f32.xlu0 %v20_v3 }
  0x90   :  { %v19_v4 = vpop.xlane.xlu0 %18 }
  0x91   :  { %v24_v5 = vmul.f32 0.03125, %v19_v4 }
  0x93   :  { %v26_v6 = vsub.f32 %v14_v0, %v24_v5 }
  0x94   :  { %v22_v7 = vpop.xlane.xlu0 %21 }
  0x95   :  { %v25_v8 = vmul.f32 0.03125, %v22_v7  ;;  %v28_v9 = vmul.f32 %v26_v6, %v26_v6 }
  0x97   :  { %v27_v10 = vsub.f32 %v15_v1, %v25_v8  ;;  %v30_v11 = vsel %vm16_vm0, %v28_v9, 0.0 }
  0x98   :  { %31 = vadd.xlane.f32.xlu1 %v30_v11 }
  0x99   :  { %v29_v12 = vmul.f32 %v27_v10, %v27_v10 }
  0x9b   :  { %v33_v13 = vsel %vm16_vm0, %v29_v12, 0.0 }
  0x9c   :  { %34 = vadd.xlane.f32.xlu1 %v33_v13 }
 0x125   :  { %v32_v14 = vpop.xlane.xlu1 %31 }
 0x126   :  { %v36_v15 = vmul.f32 0.03125, %v32_v14 }
 0x128   :  { %v38_v16 = vadd.f32 1e-05, %v36_v15 }
 0x129   :  { %v35_v17 = vpop.xlane.xlu1 %34 }
 0x12a   :  { %70 = vrsqrt.f32 %v38_v16  ;;  %v37_v18 = vmul.f32 0.03125, %v35_v17 }
 0x12c   :  { %v39_v19 = vadd.f32 1e-05, %v37_v18 }
 0x12e   :  { %72 = vrsqrt.f32 %v39_v19 }
 0x134   :  { %v71_v20 = vpop.eup %70 }
 0x135   :  { %v42_v22 = vmul.f32 %v71_v20, %v26_v6 }
 0x137   :  { %v51_v24 = vmul.f32 %v68_v21, %v42_v22 }
 0x138   :  { %v73_v25 = vpop.eup %72 }
 0x139   :  { %v60_v26 = vadd.f32 %v69_v23, %v51_v24  ;;  %v43_v27 = vmul.f32 %v73_v25, %v27_v10 }
 0x13b   :  { %62 = vst.msk [vmem:[%s121_s3] sm:$0xff] %vm16_vm0, %v60_v26  ;;  %v52_v28 = vmul.f32 %v68_v21, %v43_v27 }
 0x13d   :  { %v61_v29 = vadd.f32 %v69_v23, %v52_v28 }
 0x13f   :  { %63 = vst.msk [vmem:[%s121_s3 + $0x8] sm:$0xff] %vm16_vm0, %v61_v29 }

// kernel: deepseek_forward.24
= control target key start
LH: loop header
LB: loop body
LE: loop exit
PB: predicated region body
PF: predicated region fallthrough
CT: control target
= control target key end

     0   :  { %v124_v0 = vmov 0.0   ;;  %vm125_vm0 = vmmov 0   ;;  %vm48_vm1 = vcmask 261120   ;;  %s178_s1 = inlined_call_operand.vmem [shape: bf16[32,32], index: 1, kind: input, shape index: {}]   ;;  %s179_s0 = inlined_call_operand.vmem [shape: bf16[16,32], index: 0, kind: input, shape index: {}]   ;;  %s180_s2 = inlined_call_operand.vmem [shape: f32[1,32], index: 2, kind: input, shape index: {}]   ;;  %s181_s3 = inlined_call_operand.vmem [shape: f32[16,32], index: 3, kind: input, shape index: {}]   ;;  %s182_s4 = inlined_call_operand.vmem [shape: f32[16,32], index: 4, kind: output, shape index: {}]  }
   0x1   :  { %111 = vmatprep.subr.bf16.mxu0 %v124_v0  ;;  %v121_v1 = vld [vmem:[%s178_s1] sm:$0xff]   ;;  %115 = vmatprep.mubr.msk.bf16.mxu0 %vm125_vm0, %v124_v0  ;;  %v122_v2 = vld [vmem:[%s178_s1 + $0x8] sm:$0xff]  }
   0x2   :  { %112 = vmatpush3.bf16.msra.mxu0 %v121_v1  ;;  %v123_v3 = vld [vmem:[%s179_s0] sm:$0xff]   ;;  %v94_v10 = vld [vmem:[%s181_s3 + $0x8] sm:$0xff] }
   0x3   :  { %113 = vmatprep.subr.bf16.mxu0 %v124_v0  ;;  %v103_v4 = vld [vmem:[%s180_s2] ss:$0 sm:$0xff] }
   0x4   :  { %v93_v6 = vld [vmem:[%s181_s3] sm:$0xff] }
   0x6   :  { %114 = vmatpush3.bf16.msra.mxu0 %v122_v2 }
   0x9   :  { %116 = vmatmul.mubr.msk.bf16.vlgmr.msra.gmra.mrb[0].mxu0 %vm48_vm1, %v123_v3 }
  0xdc   :  { %v86_v5 = vpop.f32.mrb[0].mxu0 }
  0xdd   :  { %v87_v7 = vadd.f32 %v103_v4, %v86_v5  ;;  %v117_v8 = vpop.f32.mrb[1].mxu0 }
  0xde   :  { %v89_v9 = vpop.f32.mrb[2].mxu0 }
  0xdf   :  { %v95_v11 = vadd.f32 %v93_v6, %v87_v7  ;;  %v90_v12 = vadd.f32 %v103_v4, %v89_v9  ;;  %v118_v13 = vpop.f32.mrb[3].mxu0 }
  0xe1   :  { %97 = vst.msk [vmem:[%s182_s4] sm:$0xff] %vm48_vm1, %v95_v11  ;;  %v96_v14 = vadd.f32 %v94_v10, %v90_v12 }
  0xe3   :  { %98 = vst.msk [vmem:[%s182_s4 + $0x8] sm:$0xff] %vm48_vm1, %v96_v14 }

// kernel: deepseek_forward.26
= control target key start
LH: loop header
LB: loop body
LE: loop exit
PB: predicated region body
PF: predicated region fallthrough
CT: control target
= control target key end

     0   :  { %v101_v0 = vmov 0.0   ;;  %vm102_vm0 = vmmov 0   ;;  %vm31_vm1 = vcmask 261120   ;;  %vm76_vm2 = vcmask 31744   ;;  %s136_s1 = inlined_call_operand.vmem [shape: bf16[32,4], index: 1, kind: input, shape index: {}]   ;;  %s137_s0 = inlined_call_operand.vmem [shape: f32[16,32], index: 0, kind: input, shape index: {}]   ;;  %s138_s2 = inlined_call_operand.vmem [shape: f32[16,4], index: 2, kind: output, shape index: {}]  }
   0x1   :  { %89 = vmatprep.subr.bf16.mxu0 %v101_v0  ;;  %v99_v1 = vld [vmem:[%s136_s1] sm:$0xff]   ;;  %93 = vmatprep.mubr.msk.bf16.mxu0 %vm102_vm0, %v101_v0  ;;  %v100_v2 = vld [vmem:[%s136_s1 + $0x8] sm:$0xff]  }
   0x2   :  { %90 = vmatpush3.bf16.msra.mxu0 %v99_v1  ;;  %v12_v3 = vld [vmem:[%s137_s0] sm:$0xff]  ;;  %v13_v4 = vld [vmem:[%s137_s0 + $0x8] sm:$0xff] }
   0x3   :  { %91 = vmatprep.subr.bf16.mxu0 %v101_v0  ;;  %v14_v5 = vpack.c.bf16 %v13_v4, %v12_v3 }
   0x6   :  { %92 = vmatpush3.bf16.msra.mxu0 %v100_v2 }
   0x9   :  { %94 = vmatmul.mubr.msk.bf16.vlgmr.msra.gmra.mrb[0].mxu0 %vm31_vm1, %v14_v5 }
  0xdc   :  { %v69_v6 = vpop.f32.mrb[0].mxu0 }
  0xdd   :  { %77 = vst.msk [vmem:[%s138_s2] sm:$0xff] %vm76_vm2, %v69_v6  ;;  %v95_v7 = vpop.f32.mrb[1].mxu0 }
  0xde   :  { %v72_v8 = vpop.f32.mrb[2].mxu0 }
  0xdf   :  { %78 = vst.msk [vmem:[%s138_s2 + $0x8] sm:$0xff] %vm76_vm2, %v72_v8  ;;  %v96_v9 = vpop.f32.mrb[3].mxu0 }

// kernel: deepseek_forward.39
= control target key start
LH: loop header
LB: loop body
LE: loop exit
PB: predicated region body
PF: predicated region fallthrough
CT: control target
= control target key end

     0   :  { %v133_v1 = vmov 0.0   ;;  %vm134_vm0 = vmmov 0   ;;  %s172_s0 = inlined_call_operand.vmem [shape: f32[2,32], index: 0, kind: input, shape index: {}]   ;;  %s173_s1 = inlined_call_operand.vmem [shape: bf16[32,128], index: 1, kind: input, shape index: {}]   ;;  %s174_s2 = inlined_call_operand.hbm [shape: f32[2,128], index: 2, kind: output, shape index: {}]  }
   0x1   :  { %v107_v0 = vld [vmem:[%s173_s1] sm:$0xff]   ;;  %96 = vmatprep.subr.bf16.mxu0 %v133_v1  ;;  %v108_v2 = vld [vmem:[%s173_s1 + $0x8] sm:$0xff]   ;;  %100 = vmatprep.mubr.msk.bf16.mxu0 %vm134_vm0, %v133_v1 }
   0x2   :  { %97 = vmatpush3.bf16.msra.mxu0 %v107_v0  ;;  %v13_v3 = vld [vmem:[%s172_s0] sm:$0x3] }
   0x3   :  { %7 = vsyncpa [#allocation3], 0  ;;  %98 = vmatprep.subr.bf16.mxu0 %v133_v1  ;;  %v14_v4 = vpack.c.bf16 %v13_v3, %v13_v3  ;;  %vm31_vm1 = vcmask 261120   ;;  %s135_s15 = smov [#allocation2]  }
   0x4   :  { %s82_s16 = sshll.u32 %s135_s15, 4  ;;  %s83_s16 = int_to_ptr.vmem [resolvable:$true] %s82_s16 }
   0x5   :  { %s109_s1 = scalar_lea.vmem %s83_s16, 32  ;;  %p114_p1 = scmp.lt.s32.totalorder %s83_s16, %s83_s16 }
   0x6   :  { %99 = vmatpush3.bf16.msra.mxu0 %v108_v2  ;;  %p110_p0 = scmp.ne.s32.totalorder %s83_s16, %s109_s1  ;;  %p115_p2 = scmp.lt.s32.totalorder %s109_s1, %s109_s1 }
   0x8   :  { %p116_p3 = por %p115_p2, %p114_p1 }
   0x9   :  { %101 = vmatmul.mubr.msk.bf16.vlgmr.msra.gmra.mrb[0].mxu0 %vm31_vm1, %v14_v4 }
   0xa   :  { %p117_p4 = pnand %p116_p3, %p110_p0 }
  0xdc   :  { %v69_v5 = vpop.f32.mrb[0].mxu0 }
  0xdd   :  { %75 = vst [vmem:[#allocation2] sm:$0x3] %v69_v5  ;;  %v102_v6 = vpop.f32.mrb[1].mxu0 }
  0xde   :  { %v72_v7 = vpop.f32.mrb[2].mxu0 }
  0xdf   :  { %120 = shalt.err (!%p117_p4)
}
  0xe0   :  { %s121_s18 = scalar_lea.hbm %s174_s2, 32 }
  0xe1   :  { %p122_p5 = scmp.ne.s32.totalorder %s174_s2, %s121_s18  ;;  %p125_p6 = scmp.lt.u32.totalorder %s121_s18, %s174_s2 }
  0xe3   :  { %p127_p7 = pnand %p125_p6, %p122_p5 }
  0xe5   :  { %130 = shalt.err (!%p127_p7)
}
  0xe6   :  { %85 = dma.vmem_to_hbm [thread:$0]  %s83_s16, 32, %s174_s2, [#allocation3]   ;;  %v103_v8 = vpop.f32.mrb[3].mxu0 }
  0xe7   :  { %131 = dma.done.wait [#allocation3], 32  }
  0xe8   :  { %132 = vsyncadd [#allocation3], 4294967264 }
  0xe9   :  { %89 = vsyncpa [#allocation3], 1 }

// kernel: deepseek_forward.28
= control target key start
LH: loop header
LB: loop body
LE: loop exit
PB: predicated region body
PF: predicated region fallthrough
CT: control target
= control target key end

     0   :  { %vm19_vm0 = vcmask 261120   ;;  %s136_s0 = inlined_call_operand.vmem [shape: f32[16,32], index: 0, kind: input, shape index: {}]   ;;  %s137_s1 = inlined_call_operand.vmem [shape: f32[1,32], index: 1, kind: input, shape index: {}]   ;;  %s138_s2 = inlined_call_operand.vmem [shape: f32[1,32], index: 2, kind: input, shape index: {}]   ;;  %s139_s3 = inlined_call_operand.vmem [shape: f32[16,32], index: 3, kind: input, shape index: {}]   ;;  %s140_s4 = inlined_call_operand.vmem [shape: f32[16,32], index: 4, kind: output, shape index: {}]  }
   0x1   :  { %v17_v0 = vld [vmem:[%s136_s0] sm:$0xff]  ;;  %v18_v1 = vld [vmem:[%s136_s0 + $0x8] sm:$0xff] }
   0x2   :  { %v20_v2 = vsel %vm19_vm0, %v17_v0, 0.0  ;;  %v23_v3 = vsel %vm19_vm0, %v18_v1, 0.0  ;;  %v75_v21 = vld [vmem:[%s137_s1] ss:$0 sm:$0xff]  ;;  %v66_v31 = vld [vmem:[%s139_s3 + $0x8] sm:$0xff] }
   0x3   :  { %21 = vadd.xlane.f32.xlu0 %v20_v2  ;;  %v76_v23 = vld [vmem:[%s138_s2] ss:$0 sm:$0xff] }
   0x4   :  { %v65_v26 = vld [vmem:[%s139_s3] sm:$0xff] }
   0x7   :  { %24 = vadd.xlane.f32.xlu0 %v23_v3 }
  0x90   :  { %v22_v4 = vpop.xlane.xlu0 %21 }
  0x91   :  { %v27_v5 = vmul.f32 0.03125, %v22_v4 }
  0x93   :  { %v29_v6 = vsub.f32 %v17_v0, %v27_v5 }
  0x94   :  { %v25_v7 = vpop.xlane.xlu0 %24 }
  0x95   :  { %v28_v8 = vmul.f32 0.03125, %v25_v7  ;;  %v31_v9 = vmul.f32 %v29_v6, %v29_v6 }
  0x97   :  { %v30_v10 = vsub.f32 %v18_v1, %v28_v8  ;;  %v33_v11 = vsel %vm19_vm0, %v31_v9, 0.0 }
  0x98   :  { %34 = vadd.xlane.f32.xlu1 %v33_v11 }
  0x99   :  { %v32_v12 = vmul.f32 %v30_v10, %v30_v10 }
  0x9b   :  { %v36_v13 = vsel %vm19_vm0, %v32_v12, 0.0 }
  0x9c   :  { %37 = vadd.xlane.f32.xlu1 %v36_v13 }
 0x125   :  { %v35_v14 = vpop.xlane.xlu1 %34 }
 0x126   :  { %v39_v15 = vmul.f32 0.03125, %v35_v14 }
 0x128   :  { %v41_v16 = vadd.f32 1e-05, %v39_v15 }
 0x129   :  { %v38_v17 = vpop.xlane.xlu1 %37 }
 0x12a   :  { %77 = vrsqrt.f32 %v41_v16  ;;  %v40_v18 = vmul.f32 0.03125, %v38_v17 }
 0x12c   :  { %v42_v19 = vadd.f32 1e-05, %v40_v18 }
 0x12e   :  { %79 = vrsqrt.f32 %v42_v19 }
 0x134   :  { %v78_v20 = vpop.eup %77 }
 0x135   :  { %v45_v22 = vmul.f32 %v78_v20, %v29_v6 }
 0x137   :  { %v54_v24 = vmul.f32 %v75_v21, %v45_v22 }
 0x138   :  { %v80_v25 = vpop.eup %79 }
 0x139   :  { %v63_v27 = vadd.f32 %v76_v23, %v54_v24  ;;  %v46_v28 = vmul.f32 %v80_v25, %v30_v10 }
 0x13b   :  { %v67_v29 = vadd.f32 %v65_v26, %v63_v27  ;;  %v55_v30 = vmul.f32 %v75_v21, %v46_v28 }
 0x13d   :  { %69 = vst.msk [vmem:[%s140_s4] sm:$0xff] %vm19_vm0, %v67_v29  ;;  %v64_v32 = vadd.f32 %v76_v23, %v55_v30 }
 0x13f   :  { %v68_v33 = vadd.f32 %v66_v31, %v64_v32 }
 0x141   :  { %70 = vst.msk [vmem:[%s140_s4 + $0x8] sm:$0xff] %vm19_vm0, %v68_v33 }

// kernel: deepseek_forward.27
= control target key start
LH: loop header
LB: loop body
LE: loop exit
PB: predicated region body
PF: predicated region fallthrough
CT: control target
= control target key end

     0   :  { %s954_s21 = smov 0   ;;  %s956_s22 = smov 0   ;;  %s1072_s0 = inlined_call_operand.vmem [shape: f32[16,32], index: 0, kind: input, shape index: {}]   ;;  %s1073_s1 = inlined_call_operand.vmem [shape: f32[16,4], index: 1, kind: input, shape index: {}]   ;;  %s1074_s2 = inlined_call_operand.vmem [shape: bf16[4,32,128], index: 2, kind: input, shape index: {}]   ;;  %s1075_s3 = inlined_call_operand.vmem [shape: f32[4,1,128], index: 3, kind: input, shape index: {}]   ;;  %s1076_s4 = inlined_call_operand.vmem [shape: bf16[4,128,32], index: 4, kind: input, shape index: {}]   ;;  %s1077_s5 = inlined_call_operand.vmem [shape: f32[4,1,32], index: 5, kind: input, shape index: {}]   ;;  %s1078_s6 = inlined_call_operand.vmem [shape: f32[16,32], index: 6, kind: output, shape index: {}]  }
   0x1   :  { %s958_s23 = smov 0  }
   0x2 LB: > { %s31_s24 = sadd.s32 1, %s910_s22  ;;  %p785_p0 = scmp.ge.s32.totalorder %s914_s23, 1  ;;  %s914_s23 = sphi %s958_s23, %s16_s23   ;;  %s910_s22 = sphi %s956_s22, %s1080_s22   ;;  %s906_s21 = sphi %s954_s21, %s1079_s21  }
   0x3   : > { %p33_p1 = scmp.ge.s32.totalorder %s31_s24, 4  ;;  %p296_p2 = scmp.lt.s32.totalorder %s914_s23, 5 }
   0x5   : > { %s1082_s24 = smov (%p33_p1, %s31_s24), 0  ;;  %p297_p3 = pnand %p785_p0, %p296_p2 }
   0x6   : > { %p369_p4 = scmp.lt.s32.totalorder (!%p297_p3), %s906_s21, 3  ;;  %p403_p5 = scmp.eq.s32.totalorder (!%p297_p3), %s906_s21, 0 }
   0x7   : > { %300 = sbr.rel (%p297_p3) target bundleno = 485 (0x1e5), region = 44 }
   0xe   : > { %s977_s25 = scalar_select %p369_p4, %s906_s21, 3 }
   0xf   : > { %408 = sbr.rel (!%p403_p5) target bundleno = 22 (0x16), region = 48  ;;  %vm409_vm0 = vcmask (%p403_p5), 261120   ;;  %v916_v0 = vmov (%p403_p5), 0.0  }
  0x10   : > { %s808_s26 = sshll.u32 %s977_s25, 4  ;;  %s382_s29 = scalar_lea.vmem %s1075_s3, %s977_s25  ;;  %410 = vst.msk [vmem:[%s1078_s6] sm:$0xff] (%p403_p5), %vm409_vm0, %v916_v0  ;;  %411 = vst.msk [vmem:[%s1078_s6 + $0x8] sm:$0xff] (%p403_p5), %vm409_vm0, %v916_v0 }
  0x11   : > { %s376_s8 = scalar_lea.vmem %s1074_s2, %s808_s26  ;;  %s809_s9 = sshll.u32 %s977_s25, 6 }
  0x12   : > { %s991_s12 = scalar_lea.vmem %s1076_s4, %s809_s9  ;;  %s395_s15 = scalar_lea.vmem %s1077_s5, %s977_s25 }
  0x16 PF: > { %v878_v1 = vld [vmem:[%s376_s8] sm:$0xff]   ;;  %v917_v2 = vmov 0.0   ;;  %v879_v3 = vld [vmem:[%s376_s8 + $0x8] sm:$0xff]   ;;  %vm918_vm1 = vmmov 0   ;;  %vm438_vm2 = vcmask 261120   ;;  %v882_v9 = vld [vmem:[%s991_s12 + $0x10] sm:$0xff]   ;;  %v601_v15 = vlaneseq }
  0x17   : > { %823 = vmatprep.subr.bf16.mxu0 %v917_v2  ;;  %831 = vmatprep.subr.bf16.mxu1 %v917_v2  ;;  %v412_v4 = vld [vmem:[%s1072_s0] sm:$0xff]  ;;  %v413_v5 = vld [vmem:[%s1072_s0 + $0x8] sm:$0xff]  ;;  %v883_v10 = vld [vmem:[%s991_s12 + $0x18] sm:$0xff]   ;;  %v603_v16 = vstv %s906_s21  ;;  %vm607_vm3 = vcmask 31744  }
  0x18   : > { %824 = vmatpush3.bf16.msra.mxu0 %v878_v1  ;;  %827 = vmatprep.mubr.msk.bf16.mxu0 %vm918_vm1, %v917_v2  ;;  %v880_v6 = vld [vmem:[%s991_s12] sm:$0xff]   ;;  %v881_v7 = vld [vmem:[%s991_s12 + $0x8] sm:$0xff]   ;;  %v414_v8 = vpack.c.bf16 %v413_v5, %v412_v4  ;;  %v886_v13 = vld [vmem:[%s991_s12 + $0x30] sm:$0xff]   ;;  %v602_v18 = vand.u32 127, %v601_v15 }
  0x19   : > { %825 = vmatprep.subr.bf16.mxu0 %v917_v2  ;;  %847 = vmatprep.mubr.msk.bf16.mxu1 %vm918_vm1, %v917_v2  ;;  %v884_v11 = vld [vmem:[%s991_s12 + $0x20] sm:$0xff]   ;;  %v885_v12 = vld [vmem:[%s991_s12 + $0x28] sm:$0xff]   ;;  %v887_v14 = vld [vmem:[%s991_s12 + $0x38] sm:$0xff]  }
  0x1a   : > { %832 = vmatpush3.bf16.msra.mxu1 %v880_v6  ;;  %v599_v17 = vld [vmem:[%s1073_s1] sm:$0xff]  ;;  %v600_v19 = vld [vmem:[%s1073_s1 + $0x8] sm:$0xff]  ;;  %vm604_vm4 = vcmp.eq.s32.totalorder %v602_v18, %v603_v16 }
  0x1b   : > { %833 = vmatprep.subr.bf16.mxu1 %v917_v2  ;;  %v605_v20 = vsel %vm604_vm4, %v599_v17, 0.0  ;;  %v606_v21 = vsel %vm604_vm4, %v600_v19, 0.0  ;;  %v791_v24 = vld [vmem:[%s382_s29] ss:$0 sm:$0xff]  ;;  %v618_v47 = vld [vmem:[%s1078_s6 + $0x8] sm:$0xff] }
  0x1c   : > { %826 = vmatpush3.bf16.msra.mxu0 %v879_v3  ;;  %v608_v22 = vsel %vm607_vm3, %v605_v20, 0.0  ;;  %v611_v23 = vsel %vm607_vm3, %v606_v21, 0.0  ;;  %v803_v42 = vld [vmem:[%s395_s15] ss:$0 sm:$0xff] }
  0x1d   : > { %609 = vadd.xlane.f32.xlu0 %v608_v22  ;;  %v617_v44 = vld [vmem:[%s1078_s6] sm:$0xff] }
  0x1e   : > { %834 = vmatpush3.bf16.msra.mxu1 %v881_v7 }
  0x1f   : > { %828 = vmatmul.mubr.msk.bf16.vlgmr.msra.gmra.mrb[0].mxu0 %vm438_vm2, %v414_v8  ;;  %835 = vmatprep.subr.bf16.mxu1 %v917_v2 }
  0x21   : > { %612 = vadd.xlane.f32.xlu0 %v611_v23 }
  0x22   : > { %836 = vmatpush3.bf16.msra.mxu1 %v882_v9 }
  0x23   : > { %837 = vmatprep.subr.bf16.mxu1 %v917_v2 }
  0x26   : > { %838 = vmatpush3.bf16.msra.mxu1 %v883_v10 }
  0x27   : > { %839 = vmatprep.subr.bf16.mxu1 %v917_v2 }
  0x2a   : > { %840 = vmatpush3.bf16.msra.mxu1 %v884_v11 }
  0x2b   : > { %841 = vmatprep.subr.bf16.mxu1 %v917_v2 }
  0x2e   : > { %842 = vmatpush3.bf16.msra.mxu1 %v885_v12 }
  0x2f   : > { %843 = vmatprep.subr.bf16.mxu1 %v917_v2 }
  0x32   : > { %844 = vmatpush3.bf16.msra.mxu1 %v886_v13 }
  0x33   : > { %845 = vmatprep.subr.bf16.mxu1 %v917_v2 }
  0x36   : > { %846 = vmatpush3.bf16.msra.mxu1 %v887_v14 }
  0xaa   : > { %v610_v43 = vpop.xlane.xlu0 %609 }
  0xab   : > { %v626_v45 = vmul.f32 %v803_v42, %v610_v43 }
  0xad   : > { %v628_v46 = vadd.f32 %v626_v45, %v617_v44 }
  0xae   : > { %v613_v48 = vpop.xlane.xlu0 %612 }
  0xaf   : > { %v627_v49 = vmul.f32 %v803_v42, %v613_v48  ;;  %630 = vst.msk [vmem:[%s1078_s6] sm:$0xff] %vm438_vm2, %v628_v46 }
  0xb1   : > { %v629_v50 = vadd.f32 %v627_v49, %v618_v47 }
  0xb3   : > { %631 = vst.msk [vmem:[%s1078_s6 + $0x8] sm:$0xff] %vm438_vm2, %v629_v50 }
  0xb6   : > { %v632_v54 = vld [vmem:[%s1078_s6] sm:$0xff] }
  0xba   : > { %v633_v56 = vld [vmem:[%s1078_s6 + $0x8] sm:$0xff] }
  0xf2   : > { %v476_v25 = vpop.f32.mrb[0].mxu0 }
  0xf3   : > { %v477_v26 = vadd.f32 %v791_v24, %v476_v25  ;;  %v829_v27 = vpop.f32.mrb[1].mxu0 }
  0xf4   : > { %v479_v28 = vpop.f32.mrb[2].mxu0 }
  0xf5   : > { %v485_v29 = vmul.f32 0.70710677, %v477_v26  ;;  %v480_v30 = vadd.f32 %v791_v24, %v479_v28  ;;  %v830_v31 = vpop.f32.mrb[3].mxu0  ;;  %v483_v36 = vmul.f32 0.5, %v477_v26 }
  0xf7   : > { %888 = verf.f32 %v485_v29  ;;  %v486_v32 = vmul.f32 0.70710677, %v480_v30  ;;  %v484_v37 = vmul.f32 0.5, %v480_v30 }
  0xf9   : > { %890 = verf.f32 %v486_v32 }
 0x101   : > { %v889_v33 = vpop.eup %888 }
 0x102   : > { %v489_v34 = vadd.f32 1.0, %v889_v33 }
 0x103   : > { %v891_v35 = vpop.eup %890 }
 0x104   : > { %v490_v38 = vadd.f32 1.0, %v891_v35  ;;  %v491_v39 = vmul.f32 %v489_v34, %v483_v36 }
 0x106   : > { %v492_v40 = vmul.f32 %v490_v38, %v484_v37 }
 0x108   : > { %v493_v41 = vpack.c.bf16 %v492_v40, %v491_v39 }
 0x10a   : > { %848 = vmatmul.mubr.bf16.vlgmr.msra.gmra.mrb[0].mxu1 %v493_v41 }
 0x1dd   : > { %v592_v51 = vpop.f32.mrb[0].mxu1 }
 0x1de   : > { %v634_v52 = vmul.f32 %v610_v43, %v592_v51  ;;  %v849_v53 = vpop.f32.mrb[1].mxu1 }
 0x1df   : > { %v595_v55 = vpop.f32.mrb[2].mxu1 }
 0x1e0   : > { %v636_v57 = vadd.f32 %v634_v52, %v632_v54  ;;  %v635_v58 = vmul.f32 %v613_v48, %v595_v55  ;;  %v850_v59 = vpop.f32.mrb[3].mxu1 }
 0x1e2   : > { %638 = vst.msk [vmem:[%s1078_s6] sm:$0xff] %vm438_vm2, %v636_v57  ;;  %v637_v60 = vadd.f32 %v635_v58, %v633_v56 }
 0x1e4   : > { %639 = vst.msk [vmem:[%s1078_s6 + $0x8] sm:$0xff] %vm438_vm2, %v637_v60 }
 0x1e5 PF: > { %s16_s23 = sadd.s32 1, %s914_s23   ;;  %s1079_s21 = smov %s910_s22 }
 0x1e6   : > { %p13_p6 = scmp.ge.s32.totalorder %s16_s23, 6   ;;  %s1080_s22 = smov %s1082_s24 }
 0x1e8   :  { %15 = sbr.rel (!%p13_p6) target bundleno = 2 (0x2), region = 97 }

</bundles_post_ra>
